<compile_context>
chip_gen: v5e
topology: v5e:2x2
jax: 0.10.0
libtpu: 0.0.40
codegen_flags: <defaults>
</compile_context>

<pallas_src>
import functools

import jax
import jax.numpy as jnp
from jax.experimental import pallas as pl
from jax.experimental.pallas import tpu as pltpu

NEG_SLOPE = 0.01   # torch.nn.LeakyReLU default
LANES = 128


def _leaky_relu(x):
    return jnp.where(x >= 0, x, NEG_SLOPE * x)


def _round_up(x, m):
    return (x + m - 1) // m * m


# --------------------------------------------------------------------------
# Fused kernel
# --------------------------------------------------------------------------
def fused_encoder_kernel(*refs, dilations, has_res, K, T, S, pad_al, Bt, Cp):
    """Whole CausalCNNEncoder forward for a tile of Bt batch rows.

    Positional refs:
      x_ref                             (Bt, T, Cp)
      per block i: w1 (K*Cp, Cp), b1 (1, Cp), w2 (K*Cp, Cp), b2 (1, Cp),
                   [+ wr (Cp, Cp), br (1, Cp)  iff has_res[i]]
      wl (Cp, Cop), bl (1, Cop)
      o_ref                             (Bt, Cop)
      buf_a, buf_b                      VMEM scratch (Bt*S, Cp) ping-pong bufs
    """
    it = iter(refs)
    x_ref = next(it)
    blocks = []
    for i in range(len(dilations)):
        w1, b1, w2, b2 = next(it), next(it), next(it), next(it)
        wr, br = (next(it), next(it)) if has_res[i] else (None, None)
        blocks.append((dilations[i], w1, b1, w2, b2, wr, br))
    wl, bl = next(it), next(it)
    o_ref = next(it)
    buf_a, buf_b = next(it), next(it)

    R = Bt * S           # rows in the flat activation buffer
    M = R - pad_al       # rows each conv computes (all data rows + inter-batch pads)

    # --- causal zero padding, done in VMEM (replaces wrapper-side jnp.pad) ---
    # Zeroed every grid step so the kernel is correct under any core sharding.
    if pad_al > 0:
        zeros_pad = jnp.zeros((pad_al, Cp), jnp.float32)
        for b in range(Bt):
            buf_a[pl.ds(b * S, pad_al), :] = zeros_pad
            buf_b[pl.ds(b * S, pad_al), :] = zeros_pad

    # --- load input tile into the data rows of buf_a (per-batch left pad) ----
    for b in range(Bt):
        buf_a[pl.ds(b * S + pad_al, T), :] = x_ref[b].astype(jnp.float32)

    # rows that are real data (1.0) vs another batch's pad region (0.0)
    ridx = jax.lax.broadcasted_iota(jnp.int32, (M, 1), 0) + pad_al
    valid = ((ridx % S) >= pad_al).astype(jnp.float32)

    def dilated_causal_conv(src, wcat, bias, d):
        # im2col: K dilated-shifted (M, Cp) slices stacked on the lane axis,
        # contracted in a single MXU matmul of shape (M, K*Cp) x (K*Cp, Cp).
        taps = [src[pl.ds(pad_al - (K - 1 - k) * d, M), :] for k in range(K)]
        xcat = taps[0] if K == 1 else jnp.concatenate(taps, axis=1)
        return jnp.dot(xcat, wcat[...],
                       preferred_element_type=jnp.float32) + bias[...]

    src, dst = buf_a, buf_b
    for (d, w1, b1, w2, b2, wr, br) in blocks:
        # conv1 -> chomp -> LeakyReLU (masked so pad rows stay exactly zero)
        h1 = _leaky_relu(dilated_causal_conv(src, w1, b1, d)) * valid
        dst[pl.ds(pad_al, M), :] = h1
        # conv2 -> chomp -> LeakyReLU, reading the causally padded h1 from dst
        h2 = _leaky_relu(dilated_causal_conv(dst, w2, b2, d))
        # residual: identity when channels match (no matmul), 1x1 conv otherwise
        res = src[pl.ds(pad_al, M), :]
        if wr is not None:
            res = jnp.dot(res, wr[...],
                          preferred_element_type=jnp.float32) + br[...]
        dst[pl.ds(pad_al, M), :] = (h2 + res) * valid
        src, dst = dst, src            # block output feeds the next block

    # --- AdaptiveMaxPool1d(1) over time + SqueezeChannels + Linear ----------
    # Batched head: stack the Bt pooled rows, one MXU matmul, one full-tile
    # lane-dense store of (Bt, Cop) (Cop is 128-lane padded out_channels).
    pooled = jnp.concatenate(
        [jnp.max(src[pl.ds(b * S + pad_al, T), :], axis=0, keepdims=True)
         for b in range(Bt)], axis=0)                       # (Bt, Cp)
    o_ref[...] = (jnp.dot(pooled, wl[...], preferred_element_type=jnp.float32)
                  + bl[...]).astype(o_ref.dtype)


# --------------------------------------------------------------------------
# Wrapper
# --------------------------------------------------------------------------
def causal_cnn_encoder(x_ncl, packed):
    """x_ncl: (B, in_channels, T) PyTorch NCL layout -> (B, out_channels)."""
    block_params, dilations, has_res, wl, bl, K, Cp, pad_al, Co = packed
    B, Cin, T = x_ncl.shape
    Cop = wl.shape[1]               # lane-padded out_channels

    # Batch tile: whole batch per grid step unless B splits cleanly into 8s.
    Bt = 8 if (B % 8 == 0 and B > 8) else B
    nb = B // Bt
    S = pad_al + T

    # Layout once: NCL -> (B, T, C), channels zero-padded to Cp lanes so every
    # in-kernel store is lane-dense and padded lanes are exactly zero.
    x = jnp.transpose(x_ncl, (0, 2, 1))
    x = jnp.pad(x, ((0, 0), (0, 0), (0, Cp - Cin)))

    operands = [x]
    in_specs = [pl.BlockSpec((Bt, T, Cp), lambda i: (i, 0, 0))]

    def add_const2d(a):
        operands.append(a)
        in_specs.append(pl.BlockSpec(a.shape, lambda i: (0, 0)))

    for bp in block_params:
        for a in bp:
            add_const2d(a)
    add_const2d(wl)
    add_const2d(bl)

    kernel = functools.partial(
        fused_encoder_kernel, dilations=tuple(dilations),
        has_res=tuple(has_res), K=K, T=T, S=S, pad_al=pad_al, Bt=Bt, Cp=Cp)

    out_padded = pl.pallas_call(
        kernel,
        out_shape=jax.ShapeDtypeStruct((B, Cop), x_ncl.dtype),
        grid_spec=pltpu.PrefetchScalarGridSpec(
            num_scalar_prefetch=0,
            grid=(nb,),
            in_specs=in_specs,
            out_specs=pl.BlockSpec((Bt, Cop), lambda i: (i, 0)),
            scratch_shapes=[pltpu.VMEM((Bt * S, Cp), jnp.float32),
                            pltpu.VMEM((Bt * S, Cp), jnp.float32)],
        ),
        compiler_params=pltpu.CompilerParams(
            dimension_semantics=("parallel",)),
    )(*operands)
    return out_padded[:, :Co]       # strip padded output lanes


# --------------------------------------------------------------------------
# Parameters (synthetic, module-consistent shapes) + packing to kernel layout
# --------------------------------------------------------------------------
def init_params(key, in_channels, channels, depth, reduced_size,
                out_channels, kernel_size):
    """Synthetic parameters in natural shapes. Conv weights are (K, Cin, Cout)
    (transpose of PyTorch (Cout, Cin, K)); weight_norm at init is the identity."""
    blocks = []
    dilation = 1
    cin = in_channels
    for i in range(depth + 1):                    # depth blocks + final block
        cout = channels if i < depth else reduced_size
        key, k1, k2, k3, k4, k5, k6 = jax.random.split(key, 7)
        w1 = jax.random.normal(k1, (kernel_size, cin, cout), jnp.float32) * 0.1
        b1 = jax.random.normal(k2, (1, cout), jnp.float32) * 0.1
        w2 = jax.random.normal(k3, (kernel_size, cout, cout), jnp.float32) * 0.1
        b2 = jax.random.normal(k4, (1, cout), jnp.float32) * 0.1
        if cin != cout:
            wr = jax.random.normal(k5, (cin, cout), jnp.float32) * 0.1
            br = jax.random.normal(k6, (1, cout), jnp.float32) * 0.1
        else:
            wr, br = None, None                   # identity residual
        blocks.append((w1, b1, w2, b2, wr, br, dilation))
        cin = cout
        dilation *= 2
    key, kl1, kl2 = jax.random.split(key, 3)
    wl = jax.random.normal(kl1, (reduced_size, out_channels), jnp.float32) * 0.1
    bl = jax.random.normal(kl2, (1, out_channels), jnp.float32) * 0.1
    return blocks, (wl, bl)


def pack_params(blocks, linear, kernel_size):
    """Zero-pad channel dims to Cp=128 lanes and reshape conv weights to the
    im2col form (K, Cin, Cout) -> (K*Cp, Cp). The linear head is padded to
    Cop = 128-lane-padded out_channels so the kernel's output store is
    lane-dense. Done once, outside the kernel."""
    K = kernel_size
    max_c = max([b[0].shape[1] for b in blocks] + [b[0].shape[2] for b in blocks])
    Cp = _round_up(max(max_c, 1), LANES)
    max_pad = max((K - 1) * b[6] for b in blocks)
    pad_al = _round_up(max_pad, 8)

    def pad_conv(w):                               # (K, Ci, Co) -> (K*Cp, Cp)
        _, ci, co = w.shape
        w = jnp.pad(w, ((0, 0), (0, Cp - ci), (0, Cp - co)))
        return w.reshape(K * Cp, Cp)

    def pad_bias(b, width):                        # (1, c) -> (1, width)
        return jnp.pad(b, ((0, 0), (0, width - b.shape[1])))

    packed_blocks, dilations, has_res = [], [], []
    for (w1, b1, w2, b2, wr, br, d) in blocks:
        params = [pad_conv(w1), pad_bias(b1, Cp), pad_conv(w2), pad_bias(b2, Cp)]
        if wr is not None:
            params += [jnp.pad(wr, ((0, Cp - wr.shape[0]), (0, Cp - wr.shape[1]))),
                       pad_bias(br, Cp)]
        packed_blocks.append(tuple(params))
        dilations.append(d)
        has_res.append(wr is not None)

    wl, bl = linear
    Co = wl.shape[1]
    Cop = _round_up(Co, LANES)
    wl_p = jnp.pad(wl, ((0, Cp - wl.shape[0]), (0, Cop - Co)))   # (Cp, Cop)
    bl_p = pad_bias(bl, Cop)                                     # (1, Cop)
    return (packed_blocks, dilations, has_res, wl_p, bl_p, K, Cp, pad_al, Co)


# --------------------------------------------------------------------------
# Pure-JAX reference (same math, natural shapes) for a correctness check
# --------------------------------------------------------------------------
def _ref_forward(x_ncl, blocks, linear, K):
    x = jnp.transpose(x_ncl, (0, 2, 1))            # (B, T, C)
    for (w1, b1, w2, b2, wr, br, d) in blocks:
        pad = (K - 1) * d
        T_ = x.shape[1]

        def conv(inp, w, bb):
            xp = jnp.pad(inp, ((0, 0), (pad, 0), (0, 0)))
            acc = sum(jnp.einsum('btc,cd->btd', xp[:, k * d:k * d + T_, :], w[k])
                      for k in range(K))
            return acc + bb

        h1 = _leaky_relu(conv(x, w1, b1))
        h2 = _leaky_relu(conv(h1, w2, b2))
        res = x if wr is None else jnp.einsum('btc,cd->btd', x, wr) + br
        x = h2 + res
    wl, bl = linear
    return jnp.max(x, axis=1) @ wl + bl


if __name__ == "__main__":
    B = 2
    in_channels = 4
    channels = 8
    depth = 2
    reduced_size = 16
    out_channels = 32
    kernel_size = 3
    T = 16

    key = jax.random.PRNGKey(0)
    key, kx, kp = jax.random.split(key, 3)
    x = jax.random.normal(kx, (B, in_channels, T), jnp.float32)

    blocks, linear = init_params(kp, in_channels, channels, depth,
                                 reduced_size, out_channels, kernel_size)
    packed = pack_params(blocks, linear, kernel_size)

    out = causal_cnn_encoder(x, packed)
    out = jax.block_until_ready(out)
    assert out.shape == (B, out_channels), out.shape

    ref = _ref_forward(x, blocks, linear, kernel_size)
    err = float(jnp.max(jnp.abs(out - ref)))
    assert err < 5e-2, f"kernel/reference mismatch: max abs err {err}"

    print("KERNEL_OK")
</pallas_src>

<mosaic_0001>
module attributes {stable_mosaic.version = 11 : i64} {
  func.func @fused_encoder_kernel(%arg0: i32, %arg1: memref<2x16x128xf32, #tpu.memory_space<vmem>>, %arg2: memref<384x128xf32, #tpu.memory_space<vmem>>, %arg3: memref<1x128xf32, #tpu.memory_space<vmem>>, %arg4: memref<384x128xf32, #tpu.memory_space<vmem>>, %arg5: memref<1x128xf32, #tpu.memory_space<vmem>>, %arg6: memref<128x128xf32, #tpu.memory_space<vmem>>, %arg7: memref<1x128xf32, #tpu.memory_space<vmem>>, %arg8: memref<384x128xf32, #tpu.memory_space<vmem>>, %arg9: memref<1x128xf32, #tpu.memory_space<vmem>>, %arg10: memref<384x128xf32, #tpu.memory_space<vmem>>, %arg11: memref<1x128xf32, #tpu.memory_space<vmem>>, %arg12: memref<384x128xf32, #tpu.memory_space<vmem>>, %arg13: memref<1x128xf32, #tpu.memory_space<vmem>>, %arg14: memref<384x128xf32, #tpu.memory_space<vmem>>, %arg15: memref<1x128xf32, #tpu.memory_space<vmem>>, %arg16: memref<128x128xf32, #tpu.memory_space<vmem>>, %arg17: memref<1x128xf32, #tpu.memory_space<vmem>>, %arg18: memref<128x128xf32, #tpu.memory_space<vmem>>, %arg19: memref<1x128xf32, #tpu.memory_space<vmem>>, %arg20: memref<2x128xf32, #tpu.memory_space<vmem>>, %arg21: memref<48x128xf32, #tpu.memory_space<vmem>>, %arg22: memref<48x128xf32, #tpu.memory_space<vmem>>) attributes {dimension_semantics = [#tpu.dimension_semantics<parallel>], iteration_bounds = array<i64: 1>, scalar_prefetch = 0 : i64, scratch_operands = 2 : i64, tpu.core_type = #tpu.core_type<tc>, window_params = [{transform_indices = @transform_0, window_bounds = array<i64: 2, 16, 128>}, {pipeline_mode = #tpu.pipeline_mode<synchronous>, transform_indices = @transform_1, window_bounds = array<i64: 384, 128>}, {pipeline_mode = #tpu.pipeline_mode<synchronous>, transform_indices = @transform_2, window_bounds = array<i64: 1, 128>}, {pipeline_mode = #tpu.pipeline_mode<synchronous>, transform_indices = @transform_3, window_bounds = array<i64: 384, 128>}, {pipeline_mode = #tpu.pipeline_mode<synchronous>, transform_indices = @transform_4, window_bounds = array<i64: 1, 128>}, {pipeline_mode = #tpu.pipeline_mode<synchronous>, transform_indices = @transform_5, window_bounds = array<i64: 128, 128>}, {pipeline_mode = #tpu.pipeline_mode<synchronous>, transform_indices = @transform_6, window_bounds = array<i64: 1, 128>}, {pipeline_mode = #tpu.pipeline_mode<synchronous>, transform_indices = @transform_7, window_bounds = array<i64: 384, 128>}, {pipeline_mode = #tpu.pipeline_mode<synchronous>, transform_indices = @transform_8, window_bounds = array<i64: 1, 128>}, {pipeline_mode = #tpu.pipeline_mode<synchronous>, transform_indices = @transform_9, window_bounds = array<i64: 384, 128>}, {pipeline_mode = #tpu.pipeline_mode<synchronous>, transform_indices = @transform_10, window_bounds = array<i64: 1, 128>}, {pipeline_mode = #tpu.pipeline_mode<synchronous>, transform_indices = @transform_11, window_bounds = array<i64: 384, 128>}, {pipeline_mode = #tpu.pipeline_mode<synchronous>, transform_indices = @transform_12, window_bounds = array<i64: 1, 128>}, {pipeline_mode = #tpu.pipeline_mode<synchronous>, transform_indices = @transform_13, window_bounds = array<i64: 384, 128>}, {pipeline_mode = #tpu.pipeline_mode<synchronous>, transform_indices = @transform_14, window_bounds = array<i64: 1, 128>}, {pipeline_mode = #tpu.pipeline_mode<synchronous>, transform_indices = @transform_15, window_bounds = array<i64: 128, 128>}, {pipeline_mode = #tpu.pipeline_mode<synchronous>, transform_indices = @transform_16, window_bounds = array<i64: 1, 128>}, {pipeline_mode = #tpu.pipeline_mode<synchronous>, transform_indices = @transform_17, window_bounds = array<i64: 128, 128>}, {pipeline_mode = #tpu.pipeline_mode<synchronous>, transform_indices = @transform_18, window_bounds = array<i64: 1, 128>}, {transform_indices = @transform_19, window_bounds = array<i64: 2, 128>}]} {
    %cst = arith.constant 0.000000e+00 : f32
    %0 = vector.broadcast %cst : f32 to vector<8x128xf32>
    %c0 = arith.constant 0 : index
    %c0_0 = arith.constant 0 : index
    %1 = vector.load %arg21[%c0, %c0_0] : memref<48x128xf32, #tpu.memory_space<vmem>>, vector<8x128xf32>
    tpu.vector_store %arg21[%c0, %c0_0], %0 {strides = array<i32>} : memref<48x128xf32, #tpu.memory_space<vmem>>, vector<8x128xf32>,
    %c0_1 = arith.constant 0 : index
    %c0_2 = arith.constant 0 : index
    %2 = vector.load %arg22[%c0_1, %c0_2] : memref<48x128xf32, #tpu.memory_space<vmem>>, vector<8x128xf32>
    tpu.vector_store %arg22[%c0_1, %c0_2], %0 {strides = array<i32>} : memref<48x128xf32, #tpu.memory_space<vmem>>, vector<8x128xf32>,
    %c24 = arith.constant 24 : index
    %c0_3 = arith.constant 0 : index
    %3 = vector.load %arg21[%c24, %c0_3] : memref<48x128xf32, #tpu.memory_space<vmem>>, vector<8x128xf32>
    tpu.vector_store %arg21[%c24, %c0_3], %0 {strides = array<i32>} : memref<48x128xf32, #tpu.memory_space<vmem>>, vector<8x128xf32>,
    %c24_4 = arith.constant 24 : index
    %c0_5 = arith.constant 0 : index
    %4 = vector.load %arg22[%c24_4, %c0_5] : memref<48x128xf32, #tpu.memory_space<vmem>>, vector<8x128xf32>
    tpu.vector_store %arg22[%c24_4, %c0_5], %0 {strides = array<i32>} : memref<48x128xf32, #tpu.memory_space<vmem>>, vector<8x128xf32>,
    %c0_6 = arith.constant 0 : index
    %c0_7 = arith.constant 0 : index
    %c0_8 = arith.constant 0 : index
    %5 = vector.load %arg1[%c0_6, %c0_7, %c0_8] : memref<2x16x128xf32, #tpu.memory_space<vmem>>, vector<1x16x128xf32>
    %6 = vector.shape_cast %5 : vector<1x16x128xf32> to vector<16x128xf32>
    %c8 = arith.constant 8 : index
    %c0_9 = arith.constant 0 : index
    %7 = vector.load %arg21[%c8, %c0_9] : memref<48x128xf32, #tpu.memory_space<vmem>>, vector<16x128xf32>
    tpu.vector_store %arg21[%c8, %c0_9], %6 {strides = array<i32>} : memref<48x128xf32, #tpu.memory_space<vmem>>, vector<16x128xf32>,
    %c1 = arith.constant 1 : index
    %c0_10 = arith.constant 0 : index
    %c0_11 = arith.constant 0 : index
    %8 = vector.load %arg1[%c1, %c0_10, %c0_11] : memref<2x16x128xf32, #tpu.memory_space<vmem>>, vector<1x16x128xf32>
    %9 = vector.shape_cast %8 : vector<1x16x128xf32> to vector<16x128xf32>
    %c32 = arith.constant 32 : index
    %c0_12 = arith.constant 0 : index
    %10 = vector.load %arg21[%c32, %c0_12] : memref<48x128xf32, #tpu.memory_space<vmem>>, vector<16x128xf32>
    tpu.vector_store %arg21[%c32, %c0_12], %9 {strides = array<i32>} : memref<48x128xf32, #tpu.memory_space<vmem>>, vector<16x128xf32>,
    %11 = tpu.iota {dimensions = array<i32: 0>} : vector<40x1xi32>
    %c8_i32 = arith.constant 8 : i32
    %12 = vector.broadcast %c8_i32 : i32 to vector<40x1xi32>
    %13 = arith.addi %11, %12 : vector<40x1xi32>
    %c24_i32 = arith.constant 24 : i32
    %c0_i32 = arith.constant 0 : i32
    %14 = arith.cmpi eq, %c24_i32, %c0_i32 : i32
    %c1_i32 = arith.constant 1 : i32
    %15 = arith.select %14, %c1_i32, %c24_i32 : i32
    %16 = vector.broadcast %15 : i32 to vector<40x1xi32>
    %17 = arith.remsi %13, %16 : vector<40x1xi32>
    %c0_i32_13 = arith.constant 0 : i32
    %18 = vector.broadcast %c0_i32_13 : i32 to vector<40x1xi32>
    %19 = arith.cmpi ne, %17, %18 : vector<40x1xi32>
    %c0_i32_14 = arith.constant 0 : i32
    %20 = vector.broadcast %c0_i32_14 : i32 to vector<40x1xi32>
    %21 = arith.cmpi slt, %17, %20 : vector<40x1xi32>
    %c0_i32_15 = arith.constant 0 : i32
    %22 = arith.cmpi slt, %15, %c0_i32_15 : i32
    %23 = vector.broadcast %22 : i1 to vector<40x1xi1>
    %24 = vector.broadcast %23 : vector<40x1xi1> to vector<40x1xi1>
    %25 = arith.xori %21, %24 : vector<40x1xi1>
    %26 = arith.andi %25, %19 : vector<40x1xi1>
    %27 = vector.broadcast %15 : i32 to vector<40x1xi32>
    %28 = arith.addi %17, %27 : vector<40x1xi32>
    %29 = arith.select %26, %28, %17 : vector<40x1xi1>, vector<40x1xi32>
    %c8_i32_16 = arith.constant 8 : i32
    %30 = vector.broadcast %c8_i32_16 : i32 to vector<40x1xi32>
    %31 = arith.cmpi sge, %29, %30 : vector<40x1xi32>
    %32 = arith.extui %31 : vector<40x1xi1> to vector<40x1xi32>
    %33 = arith.sitofp %32 : vector<40x1xi32> to vector<40x1xf32>
    %c6 = arith.constant 6 : index
    %c0_17 = arith.constant 0 : index
    %34 = vector.load %arg21[%c6, %c0_17] : memref<48x128xf32, #tpu.memory_space<vmem>>, vector<40x128xf32>
    %c7 = arith.constant 7 : index
    %c0_18 = arith.constant 0 : index
    %35 = vector.load %arg21[%c7, %c0_18] : memref<48x128xf32, #tpu.memory_space<vmem>>, vector<40x128xf32>
    %c8_19 = arith.constant 8 : index
    %c0_20 = arith.constant 0 : index
    %36 = vector.load %arg21[%c8_19, %c0_20] : memref<48x128xf32, #tpu.memory_space<vmem>>, vector<40x128xf32>
    %37 = tpu.concatenate %34, %35, %36 in 1 : vector<40x128xf32>, vector<40x128xf32>, vector<40x128xf32> -> vector<40x384xf32>
    %c0_21 = arith.constant 0 : index
    %c0_22 = arith.constant 0 : index
    %38 = vector.load %arg2[%c0_21, %c0_22] : memref<384x128xf32, #tpu.memory_space<vmem>>, vector<384x128xf32>
    %cst_23 = arith.constant dense<0.000000e+00> : vector<40x128xf32>
    %39 = tpu.matmul %37, %38, %cst_23 {dimension_numbers = #tpu.dot_dimension_numbers<[1], [0], [0], [1], [0, 0, 1, 1], [], []>} : vector<40x384xf32>, vector<384x128xf32>, vector<40x128xf32> -> vector<40x128xf32>
    %c0_24 = arith.constant 0 : index
    %c0_25 = arith.constant 0 : index
    %40 = vector.load %arg3[%c0_24, %c0_25] : memref<1x128xf32, #tpu.memory_space<vmem>>, vector<1x128xf32>
    %41 = vector.broadcast %40 : vector<1x128xf32> to vector<40x128xf32>
    %42 = arith.addf %39, %41 : vector<40x128xf32>
    %cst_26 = arith.constant 0.000000e+00 : f32
    %43 = vector.broadcast %cst_26 : f32 to vector<40x128xf32>
    %44 = arith.cmpf oge, %42, %43 : vector<40x128xf32>
    %cst_27 = arith.constant 0.00999999977 : f32
    %45 = vector.broadcast %cst_27 : f32 to vector<40x128xf32>
    %46 = arith.mulf %45, %42 : vector<40x128xf32>
    %47 = arith.select %44, %42, %46 : vector<40x128xi1>, vector<40x128xf32>
    %48 = vector.broadcast %33 : vector<40x1xf32> to vector<40x128xf32>
    %49 = arith.mulf %47, %48 : vector<40x128xf32>
    %c8_28 = arith.constant 8 : index
    %c0_29 = arith.constant 0 : index
    %50 = vector.load %arg22[%c8_28, %c0_29] : memref<48x128xf32, #tpu.memory_space<vmem>>, vector<40x128xf32>
    tpu.vector_store %arg22[%c8_28, %c0_29], %49 {strides = array<i32>} : memref<48x128xf32, #tpu.memory_space<vmem>>, vector<40x128xf32>,
    %c6_30 = arith.constant 6 : index
    %c0_31 = arith.constant 0 : index
    %51 = vector.load %arg22[%c6_30, %c0_31] : memref<48x128xf32, #tpu.memory_space<vmem>>, vector<40x128xf32>
    %c7_32 = arith.constant 7 : index
    %c0_33 = arith.constant 0 : index
    %52 = vector.load %arg22[%c7_32, %c0_33] : memref<48x128xf32, #tpu.memory_space<vmem>>, vector<40x128xf32>
    %c8_34 = arith.constant 8 : index
    %c0_35 = arith.constant 0 : index
    %53 = vector.load %arg22[%c8_34, %c0_35] : memref<48x128xf32, #tpu.memory_space<vmem>>, vector<40x128xf32>
    %54 = tpu.concatenate %51, %52, %53 in 1 : vector<40x128xf32>, vector<40x128xf32>, vector<40x128xf32> -> vector<40x384xf32>
    %c0_36 = arith.constant 0 : index
    %c0_37 = arith.constant 0 : index
    %55 = vector.load %arg4[%c0_36, %c0_37] : memref<384x128xf32, #tpu.memory_space<vmem>>, vector<384x128xf32>
    %cst_38 = arith.constant dense<0.000000e+00> : vector<40x128xf32>
    %56 = tpu.matmul %54, %55, %cst_38 {dimension_numbers = #tpu.dot_dimension_numbers<[1], [0], [0], [1], [0, 0, 1, 1], [], []>} : vector<40x384xf32>, vector<384x128xf32>, vector<40x128xf32> -> vector<40x128xf32>
    %c0_39 = arith.constant 0 : index
    %c0_40 = arith.constant 0 : index
    %57 = vector.load %arg5[%c0_39, %c0_40] : memref<1x128xf32, #tpu.memory_space<vmem>>, vector<1x128xf32>
    %58 = vector.broadcast %57 : vector<1x128xf32> to vector<40x128xf32>
    %59 = arith.addf %56, %58 : vector<40x128xf32>
    %cst_41 = arith.constant 0.000000e+00 : f32
    %60 = vector.broadcast %cst_41 : f32 to vector<40x128xf32>
    %61 = arith.cmpf oge, %59, %60 : vector<40x128xf32>
    %cst_42 = arith.constant 0.00999999977 : f32
    %62 = vector.broadcast %cst_42 : f32 to vector<40x128xf32>
    %63 = arith.mulf %62, %59 : vector<40x128xf32>
    %64 = arith.select %61, %59, %63 : vector<40x128xi1>, vector<40x128xf32>
    %c8_43 = arith.constant 8 : index
    %c0_44 = arith.constant 0 : index
    %65 = vector.load %arg21[%c8_43, %c0_44] : memref<48x128xf32, #tpu.memory_space<vmem>>, vector<40x128xf32>
    %c0_45 = arith.constant 0 : index
    %c0_46 = arith.constant 0 : index
    %66 = vector.load %arg6[%c0_45, %c0_46] : memref<128x128xf32, #tpu.memory_space<vmem>>, vector<128x128xf32>
    %cst_47 = arith.constant dense<0.000000e+00> : vector<40x128xf32>
    %67 = tpu.matmul %65, %66, %cst_47 {dimension_numbers = #tpu.dot_dimension_numbers<[1], [0], [0], [1], [0, 0, 1, 1], [], []>} : vector<40x128xf32>, vector<128x128xf32>, vector<40x128xf32> -> vector<40x128xf32>
    %c0_48 = arith.constant 0 : index
    %c0_49 = arith.constant 0 : index
    %68 = vector.load %arg7[%c0_48, %c0_49] : memref<1x128xf32, #tpu.memory_space<vmem>>, vector<1x128xf32>
    %69 = vector.broadcast %68 : vector<1x128xf32> to vector<40x128xf32>
    %70 = arith.addf %67, %69 : vector<40x128xf32>
    %71 = arith.addf %64, %70 : vector<40x128xf32>
    %72 = vector.broadcast %33 : vector<40x1xf32> to vector<40x128xf32>
    %73 = arith.mulf %71, %72 : vector<40x128xf32>
    %c8_50 = arith.constant 8 : index
    %c0_51 = arith.constant 0 : index
    %74 = vector.load %arg22[%c8_50, %c0_51] : memref<48x128xf32, #tpu.memory_space<vmem>>, vector<40x128xf32>
    tpu.vector_store %arg22[%c8_50, %c0_51], %73 {strides = array<i32>} : memref<48x128xf32, #tpu.memory_space<vmem>>, vector<40x128xf32>,
    %c4 = arith.constant 4 : index
    %c0_52 = arith.constant 0 : index
    %75 = vector.load %arg22[%c4, %c0_52] : memref<48x128xf32, #tpu.memory_space<vmem>>, vector<40x128xf32>
    %c6_53 = arith.constant 6 : index
    %c0_54 = arith.constant 0 : index
    %76 = vector.load %arg22[%c6_53, %c0_54] : memref<48x128xf32, #tpu.memory_space<vmem>>, vector<40x128xf32>
    %c8_55 = arith.constant 8 : index
    %c0_56 = arith.constant 0 : index
    %77 = vector.load %arg22[%c8_55, %c0_56] : memref<48x128xf32, #tpu.memory_space<vmem>>, vector<40x128xf32>
    %78 = tpu.concatenate %75, %76, %77 in 1 : vector<40x128xf32>, vector<40x128xf32>, vector<40x128xf32> -> vector<40x384xf32>
    %c0_57 = arith.constant 0 : index
    %c0_58 = arith.constant 0 : index
    %79 = vector.load %arg8[%c0_57, %c0_58] : memref<384x128xf32, #tpu.memory_space<vmem>>, vector<384x128xf32>
    %cst_59 = arith.constant dense<0.000000e+00> : vector<40x128xf32>
    %80 = tpu.matmul %78, %79, %cst_59 {dimension_numbers = #tpu.dot_dimension_numbers<[1], [0], [0], [1], [0, 0, 1, 1], [], []>} : vector<40x384xf32>, vector<384x128xf32>, vector<40x128xf32> -> vector<40x128xf32>
    %c0_60 = arith.constant 0 : index
    %c0_61 = arith.constant 0 : index
    %81 = vector.load %arg9[%c0_60, %c0_61] : memref<1x128xf32, #tpu.memory_space<vmem>>, vector<1x128xf32>
    %82 = vector.broadcast %81 : vector<1x128xf32> to vector<40x128xf32>
    %83 = arith.addf %80, %82 : vector<40x128xf32>
    %cst_62 = arith.constant 0.000000e+00 : f32
    %84 = vector.broadcast %cst_62 : f32 to vector<40x128xf32>
    %85 = arith.cmpf oge, %83, %84 : vector<40x128xf32>
    %cst_63 = arith.constant 0.00999999977 : f32
    %86 = vector.broadcast %cst_63 : f32 to vector<40x128xf32>
    %87 = arith.mulf %86, %83 : vector<40x128xf32>
    %88 = arith.select %85, %83, %87 : vector<40x128xi1>, vector<40x128xf32>
    %89 = vector.broadcast %33 : vector<40x1xf32> to vector<40x128xf32>
    %90 = arith.mulf %88, %89 : vector<40x128xf32>
    %c8_64 = arith.constant 8 : index
    %c0_65 = arith.constant 0 : index
    %91 = vector.load %arg21[%c8_64, %c0_65] : memref<48x128xf32, #tpu.memory_space<vmem>>, vector<40x128xf32>
    tpu.vector_store %arg21[%c8_64, %c0_65], %90 {strides = array<i32>} : memref<48x128xf32, #tpu.memory_space<vmem>>, vector<40x128xf32>,
    %c4_66 = arith.constant 4 : index
    %c0_67 = arith.constant 0 : index
    %92 = vector.load %arg21[%c4_66, %c0_67] : memref<48x128xf32, #tpu.memory_space<vmem>>, vector<40x128xf32>
    %c6_68 = arith.constant 6 : index
    %c0_69 = arith.constant 0 : index
    %93 = vector.load %arg21[%c6_68, %c0_69] : memref<48x128xf32, #tpu.memory_space<vmem>>, vector<40x128xf32>
    %c8_70 = arith.constant 8 : index
    %c0_71 = arith.constant 0 : index
    %94 = vector.load %arg21[%c8_70, %c0_71] : memref<48x128xf32, #tpu.memory_space<vmem>>, vector<40x128xf32>
    %95 = tpu.concatenate %92, %93, %94 in 1 : vector<40x128xf32>, vector<40x128xf32>, vector<40x128xf32> -> vector<40x384xf32>
    %c0_72 = arith.constant 0 : index
    %c0_73 = arith.constant 0 : index
    %96 = vector.load %arg10[%c0_72, %c0_73] : memref<384x128xf32, #tpu.memory_space<vmem>>, vector<384x128xf32>
    %cst_74 = arith.constant dense<0.000000e+00> : vector<40x128xf32>
    %97 = tpu.matmul %95, %96, %cst_74 {dimension_numbers = #tpu.dot_dimension_numbers<[1], [0], [0], [1], [0, 0, 1, 1], [], []>} : vector<40x384xf32>, vector<384x128xf32>, vector<40x128xf32> -> vector<40x128xf32>
    %c0_75 = arith.constant 0 : index
    %c0_76 = arith.constant 0 : index
    %98 = vector.load %arg11[%c0_75, %c0_76] : memref<1x128xf32, #tpu.memory_space<vmem>>, vector<1x128xf32>
    %99 = vector.broadcast %98 : vector<1x128xf32> to vector<40x128xf32>
    %100 = arith.addf %97, %99 : vector<40x128xf32>
    %cst_77 = arith.constant 0.000000e+00 : f32
    %101 = vector.broadcast %cst_77 : f32 to vector<40x128xf32>
    %102 = arith.cmpf oge, %100, %101 : vector<40x128xf32>
    %cst_78 = arith.constant 0.00999999977 : f32
    %103 = vector.broadcast %cst_78 : f32 to vector<40x128xf32>
    %104 = arith.mulf %103, %100 : vector<40x128xf32>
    %105 = arith.select %102, %100, %104 : vector<40x128xi1>, vector<40x128xf32>
    %c8_79 = arith.constant 8 : index
    %c0_80 = arith.constant 0 : index
    %106 = vector.load %arg22[%c8_79, %c0_80] : memref<48x128xf32, #tpu.memory_space<vmem>>, vector<40x128xf32>
    %107 = arith.addf %105, %106 : vector<40x128xf32>
    %108 = vector.broadcast %33 : vector<40x1xf32> to vector<40x128xf32>
    %109 = arith.mulf %107, %108 : vector<40x128xf32>
    %c8_81 = arith.constant 8 : index
    %c0_82 = arith.constant 0 : index
    %110 = vector.load %arg21[%c8_81, %c0_82] : memref<48x128xf32, #tpu.memory_space<vmem>>, vector<40x128xf32>
    tpu.vector_store %arg21[%c8_81, %c0_82], %109 {strides = array<i32>} : memref<48x128xf32, #tpu.memory_space<vmem>>, vector<40x128xf32>,
    %c0_83 = arith.constant 0 : index
    %c0_84 = arith.constant 0 : index
    %111 = vector.load %arg21[%c0_83, %c0_84] : memref<48x128xf32, #tpu.memory_space<vmem>>, vector<40x128xf32>
    %c4_85 = arith.constant 4 : index
    %c0_86 = arith.constant 0 : index
    %112 = vector.load %arg21[%c4_85, %c0_86] : memref<48x128xf32, #tpu.memory_space<vmem>>, vector<40x128xf32>
    %c8_87 = arith.constant 8 : index
    %c0_88 = arith.constant 0 : index
    %113 = vector.load %arg21[%c8_87, %c0_88] : memref<48x128xf32, #tpu.memory_space<vmem>>, vector<40x128xf32>
    %114 = tpu.concatenate %111, %112, %113 in 1 : vector<40x128xf32>, vector<40x128xf32>, vector<40x128xf32> -> vector<40x384xf32>
    %c0_89 = arith.constant 0 : index
    %c0_90 = arith.constant 0 : index
    %115 = vector.load %arg12[%c0_89, %c0_90] : memref<384x128xf32, #tpu.memory_space<vmem>>, vector<384x128xf32>
    %cst_91 = arith.constant dense<0.000000e+00> : vector<40x128xf32>
    %116 = tpu.matmul %114, %115, %cst_91 {dimension_numbers = #tpu.dot_dimension_numbers<[1], [0], [0], [1], [0, 0, 1, 1], [], []>} : vector<40x384xf32>, vector<384x128xf32>, vector<40x128xf32> -> vector<40x128xf32>
    %c0_92 = arith.constant 0 : index
    %c0_93 = arith.constant 0 : index
    %117 = vector.load %arg13[%c0_92, %c0_93] : memref<1x128xf32, #tpu.memory_space<vmem>>, vector<1x128xf32>
    %118 = vector.broadcast %117 : vector<1x128xf32> to vector<40x128xf32>
    %119 = arith.addf %116, %118 : vector<40x128xf32>
    %cst_94 = arith.constant 0.000000e+00 : f32
    %120 = vector.broadcast %cst_94 : f32 to vector<40x128xf32>
    %121 = arith.cmpf oge, %119, %120 : vector<40x128xf32>
    %cst_95 = arith.constant 0.00999999977 : f32
    %122 = vector.broadcast %cst_95 : f32 to vector<40x128xf32>
    %123 = arith.mulf %122, %119 : vector<40x128xf32>
    %124 = arith.select %121, %119, %123 : vector<40x128xi1>, vector<40x128xf32>
    %125 = vector.broadcast %33 : vector<40x1xf32> to vector<40x128xf32>
    %126 = arith.mulf %124, %125 : vector<40x128xf32>
    %c8_96 = arith.constant 8 : index
    %c0_97 = arith.constant 0 : index
    %127 = vector.load %arg22[%c8_96, %c0_97] : memref<48x128xf32, #tpu.memory_space<vmem>>, vector<40x128xf32>
    tpu.vector_store %arg22[%c8_96, %c0_97], %126 {strides = array<i32>} : memref<48x128xf32, #tpu.memory_space<vmem>>, vector<40x128xf32>,
    %c0_98 = arith.constant 0 : index
    %c0_99 = arith.constant 0 : index
    %128 = vector.load %arg22[%c0_98, %c0_99] : memref<48x128xf32, #tpu.memory_space<vmem>>, vector<40x128xf32>
    %c4_100 = arith.constant 4 : index
    %c0_101 = arith.constant 0 : index
    %129 = vector.load %arg22[%c4_100, %c0_101] : memref<48x128xf32, #tpu.memory_space<vmem>>, vector<40x128xf32>
    %c8_102 = arith.constant 8 : index
    %c0_103 = arith.constant 0 : index
    %130 = vector.load %arg22[%c8_102, %c0_103] : memref<48x128xf32, #tpu.memory_space<vmem>>, vector<40x128xf32>
    %131 = tpu.concatenate %128, %129, %130 in 1 : vector<40x128xf32>, vector<40x128xf32>, vector<40x128xf32> -> vector<40x384xf32>
    %c0_104 = arith.constant 0 : index
    %c0_105 = arith.constant 0 : index
    %132 = vector.load %arg14[%c0_104, %c0_105] : memref<384x128xf32, #tpu.memory_space<vmem>>, vector<384x128xf32>
    %cst_106 = arith.constant dense<0.000000e+00> : vector<40x128xf32>
    %133 = tpu.matmul %131, %132, %cst_106 {dimension_numbers = #tpu.dot_dimension_numbers<[1], [0], [0], [1], [0, 0, 1, 1], [], []>} : vector<40x384xf32>, vector<384x128xf32>, vector<40x128xf32> -> vector<40x128xf32>
    %c0_107 = arith.constant 0 : index
    %c0_108 = arith.constant 0 : index
    %134 = vector.load %arg15[%c0_107, %c0_108] : memref<1x128xf32, #tpu.memory_space<vmem>>, vector<1x128xf32>
    %135 = vector.broadcast %134 : vector<1x128xf32> to vector<40x128xf32>
    %136 = arith.addf %133, %135 : vector<40x128xf32>
    %cst_109 = arith.constant 0.000000e+00 : f32
    %137 = vector.broadcast %cst_109 : f32 to vector<40x128xf32>
    %138 = arith.cmpf oge, %136, %137 : vector<40x128xf32>
    %cst_110 = arith.constant 0.00999999977 : f32
    %139 = vector.broadcast %cst_110 : f32 to vector<40x128xf32>
    %140 = arith.mulf %139, %136 : vector<40x128xf32>
    %141 = arith.select %138, %136, %140 : vector<40x128xi1>, vector<40x128xf32>
    %c8_111 = arith.constant 8 : index
    %c0_112 = arith.constant 0 : index
    %142 = vector.load %arg21[%c8_111, %c0_112] : memref<48x128xf32, #tpu.memory_space<vmem>>, vector<40x128xf32>
    %c0_113 = arith.constant 0 : index
    %c0_114 = arith.constant 0 : index
    %143 = vector.load %arg16[%c0_113, %c0_114] : memref<128x128xf32, #tpu.memory_space<vmem>>, vector<128x128xf32>
    %cst_115 = arith.constant dense<0.000000e+00> : vector<40x128xf32>
    %144 = tpu.matmul %142, %143, %cst_115 {dimension_numbers = #tpu.dot_dimension_numbers<[1], [0], [0], [1], [0, 0, 1, 1], [], []>} : vector<40x128xf32>, vector<128x128xf32>, vector<40x128xf32> -> vector<40x128xf32>
    %c0_116 = arith.constant 0 : index
    %c0_117 = arith.constant 0 : index
    %145 = vector.load %arg17[%c0_116, %c0_117] : memref<1x128xf32, #tpu.memory_space<vmem>>, vector<1x128xf32>
    %146 = vector.broadcast %145 : vector<1x128xf32> to vector<40x128xf32>
    %147 = arith.addf %144, %146 : vector<40x128xf32>
    %148 = arith.addf %141, %147 : vector<40x128xf32>
    %149 = vector.broadcast %33 : vector<40x1xf32> to vector<40x128xf32>
    %150 = arith.mulf %148, %149 : vector<40x128xf32>
    %c8_118 = arith.constant 8 : index
    %c0_119 = arith.constant 0 : index
    %151 = vector.load %arg22[%c8_118, %c0_119] : memref<48x128xf32, #tpu.memory_space<vmem>>, vector<40x128xf32>
    tpu.vector_store %arg22[%c8_118, %c0_119], %150 {strides = array<i32>} : memref<48x128xf32, #tpu.memory_space<vmem>>, vector<40x128xf32>,
    %c8_120 = arith.constant 8 : index
    %c0_121 = arith.constant 0 : index
    %152 = vector.load %arg22[%c8_120, %c0_121] : memref<48x128xf32, #tpu.memory_space<vmem>>, vector<16x128xf32>
    %cst_122 = arith.constant dense<0xFF800000> : vector<128xf32>
    %153 = vector.multi_reduction <maximumf>, %152, %cst_122 [0] : vector<16x128xf32> to vector<128xf32>
    %154 = vector.shape_cast %153 : vector<128xf32> to vector<1x128xf32>
    %c32_123 = arith.constant 32 : index
    %c0_124 = arith.constant 0 : index
    %155 = vector.load %arg22[%c32_123, %c0_124] : memref<48x128xf32, #tpu.memory_space<vmem>>, vector<16x128xf32>
    %cst_125 = arith.constant dense<0xFF800000> : vector<128xf32>
    %156 = vector.multi_reduction <maximumf>, %155, %cst_125 [0] : vector<16x128xf32> to vector<128xf32>
    %157 = vector.shape_cast %156 : vector<128xf32> to vector<1x128xf32>
    %158 = tpu.concatenate %154, %157 in 0 : vector<1x128xf32>, vector<1x128xf32> -> vector<2x128xf32>
    %c0_126 = arith.constant 0 : index
    %c0_127 = arith.constant 0 : index
    %159 = vector.load %arg18[%c0_126, %c0_127] : memref<128x128xf32, #tpu.memory_space<vmem>>, vector<128x128xf32>
    %cst_128 = arith.constant dense<0.000000e+00> : vector<2x128xf32>
    %160 = tpu.matmul %158, %159, %cst_128 {dimension_numbers = #tpu.dot_dimension_numbers<[1], [0], [0], [1], [0, 0, 1, 1], [], []>} : vector<2x128xf32>, vector<128x128xf32>, vector<2x128xf32> -> vector<2x128xf32>
    %c0_129 = arith.constant 0 : index
    %c0_130 = arith.constant 0 : index
    %161 = vector.load %arg19[%c0_129, %c0_130] : memref<1x128xf32, #tpu.memory_space<vmem>>, vector<1x128xf32>
    %162 = vector.broadcast %161 : vector<1x128xf32> to vector<2x128xf32>
    %163 = arith.addf %160, %162 : vector<2x128xf32>
    %c0_131 = arith.constant 0 : index
    %c0_132 = arith.constant 0 : index
    %164 = vector.load %arg20[%c0_131, %c0_132] : memref<2x128xf32, #tpu.memory_space<vmem>>, vector<2x128xf32>
    tpu.vector_store %arg20[%c0_131, %c0_132], %163 {strides = array<i32>} : memref<2x128xf32, #tpu.memory_space<vmem>>, vector<2x128xf32>,
    return
  }
  func.func @transform_0(%arg0: i32) -> (i32, i32, i32) {
    %c0_i32 = arith.constant 0 : i32
    %c0_i32_0 = arith.constant 0 : i32
    %c0_i32_1 = arith.constant 0 : i32
    return %arg0, %c0_i32, %c0_i32_0 : i32, i32, i32
  }
  func.func @transform_1(%arg0: i32) -> (i32, i32) {
    %c0_i32 = arith.constant 0 : i32
    %c0_i32_0 = arith.constant 0 : i32
    %c0_i32_1 = arith.constant 0 : i32
    return %c0_i32, %c0_i32_0 : i32, i32
  }
  func.func @transform_2(%arg0: i32) -> (i32, i32) {
    %c0_i32 = arith.constant 0 : i32
    %c0_i32_0 = arith.constant 0 : i32
    %c0_i32_1 = arith.constant 0 : i32
    return %c0_i32, %c0_i32_0 : i32, i32
  }
  func.func @transform_3(%arg0: i32) -> (i32, i32) {
    %c0_i32 = arith.constant 0 : i32
    %c0_i32_0 = arith.constant 0 : i32
    %c0_i32_1 = arith.constant 0 : i32
    return %c0_i32, %c0_i32_0 : i32, i32
  }
  func.func @transform_4(%arg0: i32) -> (i32, i32) {
    %c0_i32 = arith.constant 0 : i32
    %c0_i32_0 = arith.constant 0 : i32
    %c0_i32_1 = arith.constant 0 : i32
    return %c0_i32, %c0_i32_0 : i32, i32
  }
  func.func @transform_5(%arg0: i32) -> (i32, i32) {
    %c0_i32 = arith.constant 0 : i32
    %c0_i32_0 = arith.constant 0 : i32
    %c0_i32_1 = arith.constant 0 : i32
    return %c0_i32, %c0_i32_0 : i32, i32
  }
  func.func @transform_6(%arg0: i32) -> (i32, i32) {
    %c0_i32 = arith.constant 0 : i32
    %c0_i32_0 = arith.constant 0 : i32
    %c0_i32_1 = arith.constant 0 : i32
    return %c0_i32, %c0_i32_0 : i32, i32
  }
  func.func @transform_7(%arg0: i32) -> (i32, i32) {
    %c0_i32 = arith.constant 0 : i32
    %c0_i32_0 = arith.constant 0 : i32
    %c0_i32_1 = arith.constant 0 : i32
    return %c0_i32, %c0_i32_0 : i32, i32
  }
  func.func @transform_8(%arg0: i32) -> (i32, i32) {
    %c0_i32 = arith.constant 0 : i32
    %c0_i32_0 = arith.constant 0 : i32
    %c0_i32_1 = arith.constant 0 : i32
    return %c0_i32, %c0_i32_0 : i32, i32
  }
  func.func @transform_9(%arg0: i32) -> (i32, i32) {
    %c0_i32 = arith.constant 0 : i32
    %c0_i32_0 = arith.constant 0 : i32
    %c0_i32_1 = arith.constant 0 : i32
    return %c0_i32, %c0_i32_0 : i32, i32
  }
  func.func @transform_10(%arg0: i32) -> (i32, i32) {
    %c0_i32 = arith.constant 0 : i32
    %c0_i32_0 = arith.constant 0 : i32
    %c0_i32_1 = arith.constant 0 : i32
    return %c0_i32, %c0_i32_0 : i32, i32
  }
  func.func @transform_11(%arg0: i32) -> (i32, i32) {
    %c0_i32 = arith.constant 0 : i32
    %c0_i32_0 = arith.constant 0 : i32
    %c0_i32_1 = arith.constant 0 : i32
    return %c0_i32, %c0_i32_0 : i32, i32
  }
  func.func @transform_12(%arg0: i32) -> (i32, i32) {
    %c0_i32 = arith.constant 0 : i32
    %c0_i32_0 = arith.constant 0 : i32
    %c0_i32_1 = arith.constant 0 : i32
    return %c0_i32, %c0_i32_0 : i32, i32
  }
  func.func @transform_13(%arg0: i32) -> (i32, i32) {
    %c0_i32 = arith.constant 0 : i32
    %c0_i32_0 = arith.constant 0 : i32
    %c0_i32_1 = arith.constant 0 : i32
    return %c0_i32, %c0_i32_0 : i32, i32
  }
  func.func @transform_14(%arg0: i32) -> (i32, i32) {
    %c0_i32 = arith.constant 0 : i32
    %c0_i32_0 = arith.constant 0 : i32
    %c0_i32_1 = arith.constant 0 : i32
    return %c0_i32, %c0_i32_0 : i32, i32
  }
  func.func @transform_15(%arg0: i32) -> (i32, i32) {
    %c0_i32 = arith.constant 0 : i32
    %c0_i32_0 = arith.constant 0 : i32
    %c0_i32_1 = arith.constant 0 : i32
    return %c0_i32, %c0_i32_0 : i32, i32
  }
  func.func @transform_16(%arg0: i32) -> (i32, i32) {
    %c0_i32 = arith.constant 0 : i32
    %c0_i32_0 = arith.constant 0 : i32
    %c0_i32_1 = arith.constant 0 : i32
    return %c0_i32, %c0_i32_0 : i32, i32
  }
  func.func @transform_17(%arg0: i32) -> (i32, i32) {
    %c0_i32 = arith.constant 0 : i32
    %c0_i32_0 = arith.constant 0 : i32
    %c0_i32_1 = arith.constant 0 : i32
    return %c0_i32, %c0_i32_0 : i32, i32
  }
  func.func @transform_18(%arg0: i32) -> (i32, i32) {
    %c0_i32 = arith.constant 0 : i32
    %c0_i32_0 = arith.constant 0 : i32
    %c0_i32_1 = arith.constant 0 : i32
    return %c0_i32, %c0_i32_0 : i32, i32
  }
  func.func @transform_19(%arg0: i32) -> (i32, i32) {
    %c0_i32 = arith.constant 0 : i32
    %c0_i32_0 = arith.constant 0 : i32
    return %arg0, %c0_i32 : i32, i32
  }
}

</mosaic_0001>

<bundles_post_ra>
// kernel: tpu_custom_call.1
= control target key start
LH: loop header
LB: loop body
LE: loop exit
PB: predicated region body
PF: predicated region fallthrough
CT: control target
= control target key end

     0   :  { %s2573_s0 = inlined_call_operand.hbm [shape: f32[2,16,128], index: 0, kind: input, shape index: {}]   ;;  %s2574_s1 = inlined_call_operand.hbm [shape: f32[384,128], index: 1, kind: input, shape index: {}]   ;;  %s2575_s2 = inlined_call_operand.vmem [shape: f32[1,128], index: 2, kind: input, shape index: {}]   ;;  %s2576_s3 = inlined_call_operand.hbm [shape: f32[384,128], index: 3, kind: input, shape index: {}]   ;;  %s2577_s4 = inlined_call_operand.vmem [shape: f32[1,128], index: 4, kind: input, shape index: {}]   ;;  %s2578_s5 = inlined_call_operand.hbm [shape: f32[128,128], index: 5, kind: input, shape index: {}]   ;;  %s2579_s6 = inlined_call_operand.vmem [shape: f32[1,128], index: 6, kind: input, shape index: {}]   ;;  %s2580_s7 = inlined_call_operand.hbm [shape: f32[384,128], index: 7, kind: input, shape index: {}]   ;;  %s2581_s8 = inlined_call_operand.vmem [shape: f32[1,128], index: 8, kind: input, shape index: {}]   ;;  %s2582_s9 = inlined_call_operand.hbm [shape: f32[384,128], index: 9, kind: input, shape index: {}]   ;;  %s2583_s10 = inlined_call_operand.vmem [shape: f32[1,128], index: 10, kind: input, shape index: {}]   ;;  %s2584_s11 = inlined_call_operand.hbm [shape: f32[384,128], index: 11, kind: input, shape index: {}]   ;;  %s2585_s12 = inlined_call_operand.vmem [shape: f32[1,128], index: 12, kind: input, shape index: {}]   ;;  %s2586_s13 = inlined_call_operand.hbm [shape: f32[384,128], index: 13, kind: input, shape index: {}]   ;;  %s2587_s14 = inlined_call_operand.vmem [shape: f32[1,128], index: 14, kind: input, shape index: {}]   ;;  %s2588_s15 = inlined_call_operand.hbm [shape: f32[128,128], index: 15, kind: input, shape index: {}]   ;;  %s2589_s16 = inlined_call_operand.vmem [shape: f32[1,128], index: 16, kind: input, shape index: {}]   ;;  %s2590_s17 = inlined_call_operand.hbm [shape: f32[128,128], index: 17, kind: input, shape index: {}]   ;;  %s2591_s18 = inlined_call_operand.vmem [shape: f32[1,128], index: 18, kind: input, shape index: {}]   ;;  %s2592_s19 = inlined_call_operand.hbm [shape: f32[2,128], index: 19, kind: output, shape index: {}]  }
   0x1   :  { %2593 = sst [smem:[#allocation29_spill]] %s2573_s0 }
   0x2   :  { %2594 = sst [smem:[#allocation30_spill]] %s2574_s1 }
   0x3   :  { %2595 = sst [smem:[#allocation31_spill]] %s2575_s2 }
   0x4   :  { %2596 = sst [smem:[#allocation32_spill]] %s2576_s3 }
   0x5   :  { %24 = vsyncpa [#allocation5], 0 }
   0x6   :  { %25 = vsyncpa [#allocation8], 0 }
   0x7   :  { %26 = vsyncpa [#allocation11], 0 }
   0x8   :  { %27 = vsyncpa [#allocation14], 0 }
   0x9   :  { %28 = vsyncpa [#allocation17], 0 }
   0xa   :  { %29 = vsyncpa [#allocation20], 0 }
   0xb   :  { %30 = vsyncpa [#allocation6], 0  ;;  %s2597_s20 = sld [smem:[#allocation30_spill]]  ;;  %s2081_s1 = smov [#allocation7]  }
   0xc   :  { %s50_s22 = sshll.u32 %s2081_s1, 4  ;;  %s78_s24 = sshll.u32 %s2578_s5, 4  ;;  %s51_s22 = int_to_ptr.vmem [resolvable:$true] %s50_s22  ;;  %s79_s24 = int_to_ptr.hbm [resolvable:$true] %s78_s24 }
   0xd   :  { %s2082_s25 = smov 128   ;;  %s2083_s3 = smov 8  }
   0xe   :  { %s2084_s26 = smov [#allocation10]   ;;  %s108_s0 = sshll.u32 %s2582_s9, 4  ;;  %s109_s0 = int_to_ptr.hbm [resolvable:$true] %s108_s0 }
   0xf   :  { %s80_s27 = sshll.u32 %s2084_s26, 4  ;;  %s2085_s1 = smov [#allocation13]   ;;  %s81_s27 = int_to_ptr.vmem [resolvable:$true] %s80_s27 }
  0x10   :  { %86 = dma.hbm_to_vmem [thread:$0]  %s79_s24, 2048, %s81_s27, [#allocation11], %s2082_s25, %s2082_s25, %s2083_s3  }
  0x11   :  { %s48_s21 = sshll.u32 %s2597_s20, 4  ;;  %s138_s20 = sshll.u32 %s2586_s13, 4  ;;  %s49_s21 = int_to_ptr.hbm [resolvable:$true] %s48_s21  ;;  %s139_s20 = int_to_ptr.hbm [resolvable:$true] %s138_s20 }
  0x12   :  { %56 = dma.hbm_to_vmem [thread:$0]  %s49_s21, 6144, %s51_s22, [#allocation8], %s2082_s25, %s2082_s25, %s2083_s3  }
  0x13   :  { %s110_s2 = sshll.u32 %s2085_s1, 4  ;;  %s2086_s21 = smov [#allocation16]   ;;  %s111_s2 = int_to_ptr.vmem [resolvable:$true] %s110_s2 }
  0x14   :  { %116 = dma.hbm_to_vmem [thread:$0]  %s109_s0, 6144, %s111_s2, [#allocation14], %s2082_s25, %s2082_s25, %s2083_s3  }
  0x15   :  { %s140_s9 = sshll.u32 %s2086_s21, 4  ;;  %s2598_s26 = sld [smem:[#allocation29_spill]]  ;;  %s141_s9 = int_to_ptr.vmem [resolvable:$true] %s140_s9 }
  0x16   :  { %146 = dma.hbm_to_vmem [thread:$0]  %s139_s20, 6144, %s141_s9, [#allocation17], %s2082_s25, %s2082_s25, %s2083_s3  }
  0x17   :  { %s2599_s27 = sld [smem:[#allocation32_spill]]  ;;  %s2087_s5 = smov [#allocation4]  }
  0x18   :  { %s37_s30 = sshll.u32 %s2087_s5, 4  ;;  %s2088_s0 = smov [#allocation9]   ;;  %s38_s30 = int_to_ptr.vmem [resolvable:$true] %s37_s30 }
  0x19   :  { %s65_s1 = sshll.u32 %s2088_s0, 4  ;;  %s93_s22 = sshll.u32 %s2580_s7, 4  ;;  %s66_s1 = int_to_ptr.vmem [resolvable:$true] %s65_s1  ;;  %s94_s22 = int_to_ptr.hbm [resolvable:$true] %s93_s22 }
  0x1a   :  { %s123_s23 = sshll.u32 %s2584_s11, 4  ;;  %s153_s5 = sshll.u32 %s2588_s15, 4  ;;  %s124_s23 = int_to_ptr.hbm [resolvable:$true] %s123_s23  ;;  %s154_s5 = int_to_ptr.hbm [resolvable:$true] %s153_s5 }
  0x1b   :  { %s35_s28 = sshll.u32 %s2598_s26, 4  ;;  %s2089_s26 = smov [#allocation12]   ;;  %s36_s28 = int_to_ptr.hbm [resolvable:$true] %s35_s28 }
  0x1c   :  { %43 = dma.hbm_to_vmem [thread:$0]  %s36_s28, 512, %s38_s30, [#allocation5], %s2082_s25, %s2082_s25, %s2083_s3  }
  0x1d   :  { %s63_s29 = sshll.u32 %s2599_s27, 4  ;;  %s95_s13 = sshll.u32 %s2089_s26, 4  ;;  %s64_s29 = int_to_ptr.hbm [resolvable:$true] %s63_s29  ;;  %s96_s13 = int_to_ptr.vmem [resolvable:$true] %s95_s13 }
  0x1e   :  { %71 = dma.hbm_to_vmem [thread:$0]  %s64_s29, 6144, %s66_s1, [#allocation8], %s2082_s25, %s2082_s25, %s2083_s3  }
  0x1f   :  { %101 = dma.hbm_to_vmem [thread:$0]  %s94_s22, 6144, %s96_s13, [#allocation11], %s2082_s25, %s2082_s25, %s2083_s3  }
  0x20   :  { %s2090_s28 = smov [#allocation15]   ;;  %s168_s30 = sshll.u32 %s2590_s17, 4  ;;  %s169_s30 = int_to_ptr.hbm [resolvable:$true] %s168_s30 }
  0x21   :  { %s125_s7 = sshll.u32 %s2090_s28, 4  ;;  %s2091_s0 = smov [#allocation18]   ;;  %s126_s7 = int_to_ptr.vmem [resolvable:$true] %s125_s7 }
  0x22   :  { %131 = dma.hbm_to_vmem [thread:$0]  %s124_s23, 6144, %s126_s7, [#allocation14], %s2082_s25, %s2082_s25, %s2083_s3  }
  0x23   :  { %s155_s1 = sshll.u32 %s2091_s0, 4  ;;  %s2092_s2 = smov [#allocation19]   ;;  %s156_s1 = int_to_ptr.vmem [resolvable:$true] %s155_s1 }
  0x24   :  { %161 = dma.hbm_to_vmem [thread:$0]  %s154_s5, 2048, %s156_s1, [#allocation17], %s2082_s25, %s2082_s25, %s2083_s3  }
  0x25   :  { %s170_s15 = sshll.u32 %s2092_s2, 4  ;;  %s171_s15 = int_to_ptr.vmem [resolvable:$true] %s170_s15 }
  0x26   :  { %176 = dma.hbm_to_vmem [thread:$0]  %s169_s30, 2048, %s171_s15, [#allocation20], %s2082_s25, %s2082_s25, %s2083_s3  }
  0x27   :  { %2067 = dma.done.wait [#allocation5], 512  }
  0x28   :  { %2068 = vsyncadd [#allocation5], 4294966784 }
  0x29   :  { %2069 = dma.done.wait [#allocation8], 12288  }
  0x2a   :  { %2070 = vsyncadd [#allocation8], 4294955008 }
  0x2b   :  { %2071 = dma.done.wait [#allocation11], 8192  }
  0x2c   :  { %2072 = vsyncadd [#allocation11], 4294959104 }
  0x2d   :  { %2073 = dma.done.wait [#allocation14], 12288  }
  0x2e   :  { %2074 = vsyncadd [#allocation14], 4294955008 }
  0x2f   :  { %2075 = dma.done.wait [#allocation17], 8192  }
  0x30   :  { %2076 = vsyncadd [#allocation17], 4294959104 }
  0x31   :  { %2077 = dma.done.wait [#allocation20], 2048  }
  0x32   :  { %2078 = vsyncadd [#allocation20], 4294965248  ;;  %v2093_v0 = vmov 0.0   ;;  %v489_v1 = vld [vmem:[#allocation7 + $0x178] sm:$0xff]  ;;  %v488_v3 = vld [vmem:[#allocation7 + $0x170] sm:$0xff]  ;;  %s2608_s3 = sld [smem:[#allocation31_spill]] }
  0x33   :  { %219 = vst [vmem:[#allocation2] sm:$0xff] %v2093_v0  ;;  %v457_v2 = vld [vmem:[#allocation7 + $0x78] sm:$0xff]  ;;  %558 = vmatpush.msra.mxu2 %v489_v1  ;;  %v456_v4 = vld [vmem:[#allocation7 + $0x70] sm:$0xff]  ;;  %v487_v6 = vld [vmem:[#allocation7 + $0x168] sm:$0xff]  ;;  %s2095_s24 = smov [#allocation21]   ;;  %s1757_s29 = sshll.u32 %s2592_s19, 4  ;;  %s1758_s29 = int_to_ptr.hbm [resolvable:$true] %s1757_s29 }
  0x34   :  { %220 = vst [vmem:[#allocation3] sm:$0xff] %v2093_v0  ;;  %494 = vmatpush.msra.mxu0 %v457_v2  ;;  %v473_v5 = vld [vmem:[#allocation7 + $0xf8] sm:$0xff]  ;;  %v455_v7 = vld [vmem:[#allocation7 + $0x68] sm:$0xff]  ;;  %v472_v8 = vld [vmem:[#allocation7 + $0xf0] sm:$0xff]  ;;  %s1755_s27 = sshll.u32 %s2095_s24, 4  ;;  %s1756_s27 = int_to_ptr.vmem [resolvable:$true] %s1755_s27 }
  0x35   :  { %221 = vst [vmem:[#allocation2 + $0x18] sm:$0xff] %v2093_v0  ;;  %526 = vmatpush.msra.mxu1 %v473_v5  ;;  %559 = vmatpush.msra.mxu2 %v488_v3  ;;  %v471_v9 = vld [vmem:[#allocation7 + $0xe8] sm:$0xff]  ;;  %v486_v10 = vld [vmem:[#allocation7 + $0x160] sm:$0xff]  ;;  %v485_v13 = vld [vmem:[#allocation7 + $0x158] sm:$0xff] }
  0x36   :  { %495 = vmatpush.msra.mxu0 %v456_v4  ;;  %v454_v11 = vld [vmem:[#allocation7 + $0x60] sm:$0xff]  ;;  %v453_v14 = vld [vmem:[#allocation7 + $0x58] sm:$0xff]  ;;  %v484_v16 = vld [vmem:[#allocation7 + $0x150] sm:$0xff] }
  0x37   :  { %527 = vmatpush.msra.mxu1 %v472_v8  ;;  %560 = vmatpush.msra.mxu2 %v487_v6  ;;  %v470_v12 = vld [vmem:[#allocation7 + $0xe0] sm:$0xff]  ;;  %v469_v15 = vld [vmem:[#allocation7 + $0xd8] sm:$0xff]  ;;  %v452_v17 = vld [vmem:[#allocation7 + $0x50] sm:$0xff] }
  0x38   :  { %496 = vmatpush.msra.mxu0 %v455_v7  ;;  %v468_v18 = vld [vmem:[#allocation7 + $0xd0] sm:$0xff]  ;;  %v483_v19 = vld [vmem:[#allocation7 + $0x148] sm:$0xff]  ;;  %v482_v22 = vld [vmem:[#allocation7 + $0x140] sm:$0xff] }
  0x39   :  { %528 = vmatpush.msra.mxu1 %v471_v9  ;;  %561 = vmatpush.msra.mxu2 %v486_v10  ;;  %v451_v20 = vld [vmem:[#allocation7 + $0x48] sm:$0xff]  ;;  %v450_v23 = vld [vmem:[#allocation7 + $0x40] sm:$0xff]  ;;  %v481_v25 = vld [vmem:[#allocation7 + $0x138] sm:$0xff] }
  0x3a   :  { %497 = vmatpush.msra.mxu0 %v454_v11  ;;  %v467_v21 = vld [vmem:[#allocation7 + $0xc8] sm:$0xff]  ;;  %v466_v24 = vld [vmem:[#allocation7 + $0xc0] sm:$0xff]  ;;  %v449_v26 = vld [vmem:[#allocation7 + $0x38] sm:$0xff] }
  0x3b   :  { %529 = vmatpush.msra.mxu1 %v470_v12  ;;  %562 = vmatpush.msra.mxu2 %v485_v13  ;;  %v480_v27 = vld [vmem:[#allocation7 + $0x130] sm:$0xff]  ;;  %v465_v29 = vld [vmem:[#allocation7 + $0xb8] sm:$0xff]  ;;  %v2259_v30 = vld [vmem:[#allocation4] sm:$0xff] }
  0x3c   :  { %498 = vmatpush.msra.mxu0 %v453_v14  ;;  %v448_v28 = vld [vmem:[#allocation7 + $0x30] sm:$0xff]  ;;  %v479_v31 = vld [vmem:[#allocation7 + $0x128] sm:$0xff]  ;;  %225 = vst [vmem:[#allocation2 + $0x8] sm:$0xff] %v2259_v30  ;;  %v478_v37 = vld [vmem:[#allocation7 + $0x120] sm:$0xff] }
  0x3d   :  { %530 = vmatpush.msra.mxu1 %v469_v15  ;;  %563 = vmatpush.msra.mxu2 %v484_v16  ;;  %v447_v32 = vld [vmem:[#allocation7 + $0x28] sm:$0xff]  ;;  %v464_v33 = vld [vmem:[#allocation7 + $0xb0] sm:$0xff]  ;;  %v446_v38 = vld [vmem:[#allocation7 + $0x20] sm:$0xff] }
  0x3e   :  { %499 = vmatpush.msra.mxu0 %v452_v17  ;;  %v2262_v34 = vld [vmem:[#allocation4 + $0x8] sm:$0xff]  ;;  %v2265_v35 = vld [vmem:[#allocation4 + $0x10] sm:$0xff]  ;;  %v462_v39 = vld [vmem:[#allocation7 + $0xa0] sm:$0xff] }
  0x3f   :  { %531 = vmatpush.msra.mxu1 %v468_v18  ;;  %564 = vmatpush.msra.mxu2 %v483_v19  ;;  %226 = vst [vmem:[#allocation2 + $0x10] sm:$0xff] %v2262_v34  ;;  %v463_v36 = vld [vmem:[#allocation7 + $0xa8] sm:$0xff]  ;;  %v477_v40 = vld [vmem:[#allocation7 + $0x118] sm:$0xff]  ;;  %v476_v43 = vld [vmem:[#allocation7 + $0x110] sm:$0xff] }
  0x40   :  { %500 = vmatpush.msra.mxu0 %v451_v20  ;;  %230 = vst [vmem:[#allocation2 + $0x20] sm:$0xff] %v2265_v35  ;;  %v445_v41 = vld [vmem:[#allocation7 + $0x18] sm:$0xff]  ;;  %v444_v44 = vld [vmem:[#allocation7 + $0x10] sm:$0xff]  ;;  %v475_v46 = vld [vmem:[#allocation7 + $0x108] sm:$0xff] }
  0x41   :  { %532 = vmatpush.msra.mxu1 %v467_v21  ;;  %565 = vmatpush.msra.mxu2 %v482_v22  ;;  %v461_v42 = vld [vmem:[#allocation7 + $0x98] sm:$0xff]  ;;  %v460_v45 = vld [vmem:[#allocation7 + $0x90] sm:$0xff]  ;;  %v443_v47 = vld [vmem:[#allocation7 + $0x8] sm:$0xff] }
  0x42   :  { %501 = vmatpush.msra.mxu0 %v450_v23  ;;  %v2268_v48 = vld [vmem:[#allocation4 + $0x18] sm:$0xff]  ;;  %v459_v49 = vld [vmem:[#allocation7 + $0x88] sm:$0xff]  ;;  %v474_v50 = vld [vmem:[#allocation7 + $0x100] sm:$0xff]  ;;  %v232_v23 = vlaneseq }
  0x43   :  { %533 = vmatpush.msra.mxu1 %v466_v24  ;;  %566 = vmatpush.msra.mxu2 %v481_v25  ;;  %231 = vst [vmem:[#allocation2 + $0x28] sm:$0xff] %v2268_v48  ;;  %v442_v51 = vld [vmem:[#allocation7] sm:$0xff]  ;;  %v813_v55 = vld [vmem:[#allocation10 + $0x78] sm:$0xff]  ;;  %v812_v59 = vld [vmem:[#allocation10 + $0x70] sm:$0xff] }
  0x44   :  { %502 = vmatpush.msra.mxu0 %v449_v26  ;;  %v427_v52 = vld [vmem:[#allocation2 + $0x6] sm:$0xff]  ;;  %v661_v56 = vld [vmem:[#allocation9 + $0xf8] sm:$0xff]  ;;  %v644_v60 = vld [vmem:[#allocation9 + $0x70] sm:$0xff]  ;;  %v2276_v24 = vshrl.u32 %v232_v23, 7 }
  0x45   :  { %534 = vmatpush.msra.mxu1 %v465_v29  ;;  %567 = vmatpush.msra.mxu2 %v480_v27  ;;  %v458_v53 = vld [vmem:[#allocation7 + $0x80] sm:$0xff]  ;;  %v645_v57 = vld [vmem:[#allocation9 + $0x78] sm:$0xff]  ;;  %v660_v61 = vld [vmem:[#allocation9 + $0xf0] sm:$0xff] }
  0x46   :  { %503 = vmatpush.msra.mxu0 %v448_v28  ;;  %v432_v54 = vld [vmem:[#allocation2 + $0x7] sm:$0xff]  ;;  %v677_v58 = vld [vmem:[#allocation9 + $0x178] sm:$0xff]  ;;  %682 = vmatpush.msra.mxu3 %v645_v57  ;;  %v676_v63 = vld [vmem:[#allocation9 + $0x170] sm:$0xff]  ;;  %v2279_v25 = vadd.s32 8, %v2276_v24 }
  0x47   :  { %535 = vmatpush.msra.mxu1 %v464_v33  ;;  %568 = vmatpush.msra.mxu2 %v479_v31  ;;  %v428_v62 = vld [vmem:[#allocation2 + $0xe] sm:$0xff]  ;;  %v810_v5 = vld [vmem:[#allocation10 + $0x60] sm:$0xff]  ;;  %v809_v9 = vld [vmem:[#allocation10 + $0x58] sm:$0xff] }
  0x48   :  { %504 = vmatpush.msra.mxu0 %v447_v32  ;;  %v811_v1 = vld [vmem:[#allocation10 + $0x68] sm:$0xff]  ;;  %683 = vmatpush.msra.mxu3 %v644_v60  ;;  %v642_v7 = vld [vmem:[#allocation9 + $0x60] sm:$0xff]  ;;  %v641_v11 = vld [vmem:[#allocation9 + $0x58] sm:$0xff]  ;;  %v245_v26 = vand.u32 65535, %v2279_v25  ;;  %v246_v27 = vshrl.u32 %v2279_v25, 16 }
  0x49   :  { %536 = vmatpush.msra.mxu1 %v463_v36  ;;  %569 = vmatpush.msra.mxu2 %v478_v37  ;;  %v643_v2 = vld [vmem:[#allocation9 + $0x68] sm:$0xff]  ;;  %v658_v8 = vld [vmem:[#allocation9 + $0xe0] sm:$0xff]  ;;  %v657_v12 = vld [vmem:[#allocation9 + $0xd8] sm:$0xff] }
  0x4a   :  { %505 = vmatpush.msra.mxu0 %v446_v38  ;;  %v659_v3 = vld [vmem:[#allocation9 + $0xe8] sm:$0xff]  ;;  %684 = vmatpush.msra.mxu3 %v643_v2  ;;  %v674_v10 = vld [vmem:[#allocation9 + $0x160] sm:$0xff]  ;;  %v673_v13 = vld [vmem:[#allocation9 + $0x158] sm:$0xff]  ;;  %v249_v28 = vmul.u32 43690, %v245_v26  ;;  %v248_v29 = vmul.u32 43691, %v245_v26  ;;  %v2283_v31 = vmul.u32 43691, %v246_v27 }
  0x4b   :  { %537 = vmatpush.msra.mxu1 %v462_v39  ;;  %570 = vmatpush.msra.mxu2 %v477_v40  ;;  %v433_v4 = vld [vmem:[#allocation2 + $0xf] sm:$0xff]  ;;  %v434_v18 = vld [vmem:[#allocation2 + $0x17] sm:$0xff]  ;;  %v435_v20 = vld [vmem:[#allocation2 + $0x1f] sm:$0xff]  ;;  %v251_v36 = vmul.u32 43690, %v246_v27  ;;  %v2287_v38 = vadd.s32 8, %v2279_v25  ;;  %v2094_v39 = vmov 0  }
  0x4c   :  { %506 = vmatpush.msra.mxu0 %v445_v41  ;;  %v675_v6 = vld [vmem:[#allocation9 + $0x168] sm:$0xff]  ;;  %685 = vmatpush.msra.mxu3 %v642_v7  ;;  %v640_v14 = vld [vmem:[#allocation9 + $0x50] sm:$0xff]  ;;  %v430_v19 = vld [vmem:[#allocation2 + $0x1e] sm:$0xff]  ;;  %v252_v32 = vshll.u32 %v249_v28, 16  ;;  %v254_v33 = vshll.u32 %v2283_v31, 16 }
  0x4d   :  { %538 = vmatpush.msra.mxu1 %v461_v42  ;;  %571 = vmatpush.msra.mxu2 %v476_v43  ;;  %v429_v15 = vld [vmem:[#allocation2 + $0x16] sm:$0xff]  ;;  %v431_v21 = vld [vmem:[#allocation2 + $0x26] sm:$0xff]  ;;  %v274_v42 = vand.u32 65535, %v2287_v38  ;;  %v275_v43 = vshrl.u32 %v2287_v38, 16 }
  0x4e   :  { %507 = vmatpush.msra.mxu0 %v444_v44  ;;  %686 = vmatpush.msra.mxu3 %v641_v11  ;;  %v656_v16 = vld [vmem:[#allocation9 + $0xd0] sm:$0xff]  ;;  %v436_v22 = vld [vmem:[#allocation2 + $0x27] sm:$0xff]  ;;  %vm256_vm0 = vc.u32 %v248_v29, %v252_v32  ;;  %v258_v37 = vadd.s32 %v252_v32, %v248_v29  ;;  %v255_v11 = vshrl.u32 %v2283_v31, 16 }
  0x4f   :  { %539 = vmatpush.msra.mxu1 %v460_v45  ;;  %572 = vmatpush.msra.mxu2 %v475_v46  ;;  %v672_v17 = vld [vmem:[#allocation9 + $0x150] sm:$0xff]  ;;  %v257_v40 = vsel %vm256_vm0, 1, %v2094_v39  ;;  %v671_v41 = vld [vmem:[#allocation9 + $0x148] sm:$0xff]  ;;  %v670_v44 = vld [vmem:[#allocation9 + $0x140] sm:$0xff]  ;;  %v2292_v46 = vmul.u32 43690, %v274_v42 }
  0x50   :  { %508 = vmatpush.msra.mxu0 %v443_v47  ;;  %687 = vmatpush.msra.mxu3 %v640_v14  ;;  %vm260_vm1 = vc.u32 %v258_v37, %v254_v33  ;;  %v259_v45 = vadd.s32 %v257_v40, %v251_v36  ;;  %v668_v57 = vld [vmem:[#allocation9 + $0x130] sm:$0xff]  ;;  %v655_v60 = vld [vmem:[#allocation9 + $0xc8] sm:$0xff]  ;;  %v637_v14 = vld [vmem:[#allocation9 + $0x38] sm:$0xff] }
  0x51   :  { %540 = vmatpush.msra.mxu1 %v459_v49  ;;  %573 = vmatpush.msra.mxu2 %v474_v50  ;;  %v261_v47 = vsel %vm260_vm1, 1, %v2094_v39  ;;  %v277_v49 = vmul.u32 43691, %v274_v42  ;;  %v2295_v50 = vmul.u32 43691, %v275_v43  ;;  %v667_v2 = vld [vmem:[#allocation9 + $0x128] sm:$0xff]  ;;  %v652_v23 = vld [vmem:[#allocation9 + $0xb0] sm:$0xff]  ;;  %v282_v42 = vshrl.u32 %v2292_v46, 16 }
  0x52   :  { %509 = vmatpush.msra.mxu0 %v442_v51  ;;  %574 = vmatmul.f32.vlgmr.msra.gmra.mxu2 %v2259_v30  ;;  %v235_v51 = vadd.s32 16, %v2276_v24  ;;  %v664_v27 = vld [vmem:[#allocation9 + $0x110] sm:$0xff]  ;;  %v635_v29 = vld [vmem:[#allocation9 + $0x28] sm:$0xff] }
  0x53   :  { %510 = vmatmul.f32.vlgmr.msra.gmra.mxu0 %v427_v52  ;;  %541 = vmatpush.msra.mxu1 %v458_v53  ;;  %v669_v52 = vld [vmem:[#allocation9 + $0x138] sm:$0xff]  ;;  %v281_v53 = vshll.u32 %v2292_v46, 16  ;;  %v651_v31 = vld [vmem:[#allocation9 + $0xa8] sm:$0xff] }
  0x54   :  { %542 = vmatmul.f32.vlgmr.msra.gmra.mxu1 %v432_v54  ;;  %818 = vmatpush.msrb.mxu2 %v813_v55  ;;  %v2299_v54 = vadd.s32 8, %v235_v51  ;;  %v253_v55 = vshrl.u32 %v249_v28, 16  ;;  %v663_v32 = vld [vmem:[#allocation9 + $0x108] sm:$0xff]  ;;  %v633_v46 = vld [vmem:[#allocation9 + $0x18] sm:$0xff] }
  0x55   :  { %714 = vmatpush.msrb.mxu0 %v661_v56  ;;  %746 = vmatpush.msrb.mxu1 %v677_v58  ;;  %v263_v56 = vadd.s32 %v261_v47, %v259_v45  ;;  %v808_v58 = vld [vmem:[#allocation10 + $0x50] sm:$0xff]  ;;  %vm2302_vm2 = vc.u32 %v277_v49, %v281_v53  ;;  %v650_v45 = vld [vmem:[#allocation9 + $0xa0] sm:$0xff] }
  0x56   :  { %819 = vmatpush.msrb.mxu2 %v812_v59  ;;  %v639_v59 = vld [vmem:[#allocation9 + $0x48] sm:$0xff]  ;;  %v304_v7 = vshrl.u32 %v2299_v54, 16  ;;  %v662_v47 = vld [vmem:[#allocation9 + $0x100] sm:$0xff] }
  0x57   :  { %715 = vmatpush.msrb.mxu0 %v660_v61  ;;  %747 = vmatpush.msrb.mxu1 %v676_v63  ;;  %v283_v61 = vshll.u32 %v2295_v50, 16  ;;  %v287_v63 = vadd.s32 %v281_v53, %v277_v49 }
  0x58   :  { %820 = vmatpush.msrb.mxu2 %v811_v1  ;;  %v303_v1 = vand.u32 65535, %v2299_v54  ;;  %688 = vmatpush.msra.mxu3 %v639_v59  ;;  %v309_v49 = vmul.u32 43690, %v304_v7 }
  0x59   :  { %716 = vmatpush.msrb.mxu0 %v659_v3  ;;  %748 = vmatpush.msrb.mxu1 %v675_v6  ;;  %v807_v3 = vld [vmem:[#allocation10 + $0x48] sm:$0xff]  ;;  %v280_v6 = vmul.u32 43690, %v275_v43  ;;  %vm289_vm3 = vc.u32 %v287_v63, %v283_v61  ;;  %v237_v61 = vadd.s32 32, %v2276_v24 }
  0x5a   :  { %577 = vmatmul.f32.gmra.mxu2 %v2262_v34  ;;  %v290_v26 = vsel %vm289_vm3, 1, %v2094_v39 }
  0x5b   :  { %513 = vmatmul.f32.gmra.mxu0 %v428_v62  ;;  %821 = vmatpush.msrb.mxu2 %v810_v5  ;;  %v654_v5 = vld [vmem:[#allocation9 + $0xc0] sm:$0xff]  ;;  %v284_v62 = vshrl.u32 %v2295_v50, 16 }
  0x5c   :  { %545 = vmatmul.f32.gmra.mxu1 %v433_v4  ;;  %717 = vmatpush.msrb.mxu0 %v658_v8  ;;  %v638_v4 = vld [vmem:[#allocation9 + $0x40] sm:$0xff] }
  0x5d   :  { %822 = vmatpush.msrb.mxu2 %v809_v9  ;;  %749 = vmatpush.msrb.mxu1 %v674_v10  ;;  %v666_v8 = vld [vmem:[#allocation9 + $0x120] sm:$0xff]  ;;  %v286_v9 = vsel %vm2302_vm2, 1, %v2094_v39  ;;  %v2311_v10 = vmul.u32 43690, %v303_v1 }
  0x5e   :  { %718 = vmatpush.msrb.mxu0 %v657_v12  ;;  %689 = vmatpush.msra.mxu3 %v638_v4  ;;  %v264_v12 = vadd.s32 %v263_v56, %v253_v55  ;;  %v804_v56 = vld [vmem:[#allocation10 + $0x30] sm:$0xff] }
  0x5f   :  { %750 = vmatpush.msrb.mxu1 %v673_v13  ;;  %823 = vmatpush.msrb.mxu2 %v808_v58  ;;  %v236_v13 = vadd.s32 24, %v2276_v24 }
  0x60   :  { %719 = vmatpush.msrb.mxu0 %v656_v16  ;;  %v665_v16 = vld [vmem:[#allocation9 + $0x118] sm:$0xff]  ;;  %690 = vmatpush.msra.mxu3 %v637_v14  ;;  %v265_v28 = vadd.s32 %v264_v12, %v255_v11 }
  0x61   :  { %751 = vmatpush.msrb.mxu1 %v672_v17  ;;  %824 = vmatpush.msrb.mxu2 %v807_v3  ;;  %v306_v17 = vmul.u32 43691, %v303_v1  ;;  %v648_v3 = vld [vmem:[#allocation9 + $0x90] sm:$0xff] }
  0x62   :  { %580 = vmatmul.f32.gmra.mxu2 %v2093_v0  ;;  %720 = vmatpush.msrb.mxu0 %v655_v60  ;;  %v266_v51 = vshrl.u32 %v265_v28, 4 }
  0x63   :  { %516 = vmatmul.f32.gmra.mxu0 %v429_v15  ;;  %752 = vmatpush.msrb.mxu1 %v671_v41  ;;  %v653_v15 = vld [vmem:[#allocation9 + $0xb8] sm:$0xff]  ;;  %v806_v41 = vld [vmem:[#allocation10 + $0x40] sm:$0xff] }
  0x64   :  { %548 = vmatmul.f32.gmra.mxu1 %v434_v18  ;;  %721 = vmatpush.msrb.mxu0 %v654_v5  ;;  %v2315_v18 = vmul.u32 43691, %v304_v7  ;;  %v2346_v7 = vadd.s32 8, %v237_v61  ;;  %v267_v50 = vmul.u32 24, %v266_v51 }
  0x65   :  { %753 = vmatpush.msrb.mxu1 %v670_v44  ;;  %825 = vmatpush.msrb.mxu2 %v806_v41  ;;  %v634_v44 = vld [vmem:[#allocation9 + $0x20] sm:$0xff] }
  0x66   :  { %722 = vmatpush.msrb.mxu0 %v653_v15  ;;  %v312_v33 = vshll.u32 %v2315_v18, 16  ;;  %v802_v15 = vld [vmem:[#allocation10 + $0x20] sm:$0xff]  ;;  %v362_v28 = vshrl.u32 %v2346_v7, 16 }
  0x67   :  { %754 = vmatpush.msrb.mxu1 %v669_v52  ;;  %v805_v52 = vld [vmem:[#allocation10 + $0x38] sm:$0xff] }
  0x68   :  { %723 = vmatpush.msrb.mxu0 %v652_v23  ;;  %826 = vmatpush.msrb.mxu2 %v805_v52  ;;  %v361_v23 = vand.u32 65535, %v2346_v7  ;;  %v2362_v36 = vmul.u32 43691, %v362_v28 }
  0x69   :  { %755 = vmatpush.msrb.mxu1 %v668_v57  ;;  %v649_v57 = vld [vmem:[#allocation9 + $0x98] sm:$0xff] }
  0x6a   :  { %583 = vmatmul.f32.gmra.mxu2 %v2265_v35  ;;  %724 = vmatpush.msrb.mxu0 %v651_v31  ;;  %v2360_v31 = vmul.u32 43690, %v361_v23 }
  0x6b   :  { %519 = vmatmul.f32.gmra.mxu0 %v430_v19  ;;  %756 = vmatpush.msrb.mxu1 %v667_v2  ;;  %v310_v19 = vshll.u32 %v2311_v10, 16  ;;  %v632_v2 = vld [vmem:[#allocation9 + $0x10] sm:$0xff] }
  0x6c   :  { %551 = vmatmul.f32.gmra.mxu1 %v435_v20  ;;  %v288_v20 = vadd.s32 %v286_v9, %v280_v6  ;;  %725 = vmatpush.msrb.mxu0 %v650_v45  ;;  %v803_v6 = vld [vmem:[#allocation10 + $0x28] sm:$0xff]  ;;  %v370_v45 = vshll.u32 %v2362_v36, 16 }
  0x6d   :  { %757 = vmatpush.msrb.mxu1 %v666_v8  ;;  %vm2322_vm4 = vc.u32 %v306_v17, %v310_v19  ;;  %v316_v37 = vadd.s32 %v310_v19, %v306_v17  ;;  %827 = vmatpush.msrb.mxu2 %v804_v56  ;;  %v631_v8 = vld [vmem:[#allocation9 + $0x8] sm:$0xff]  ;;  %v646_v17 = vld [vmem:[#allocation9 + $0x80] sm:$0xff]  ;;  %v311_v19 = vshrl.u32 %v2311_v10, 16 }
  0x6e   :  { %v292_v43 = vadd.s32 %v290_v26, %v288_v20  ;;  %v315_v53 = vsel %vm2322_vm4, 1, %v2094_v39  ;;  %726 = vmatpush.msrb.mxu0 %v649_v57  ;;  %v647_v9 = vld [vmem:[#allocation9 + $0x88] sm:$0xff]  ;;  %v801_v26 = vld [vmem:[#allocation10 + $0x18] sm:$0xff] }
  0x6f   :  { %758 = vmatpush.msrb.mxu1 %v665_v16  ;;  %vm2332_vm5 = vc.u32 %v316_v37, %v312_v33  ;;  %v317_v4 = vadd.s32 %v315_v53, %v309_v49  ;;  %828 = vmatpush.msrb.mxu2 %v803_v6  ;;  %v630_v16 = vld [vmem:[#allocation9] sm:$0xff]  ;;  %v364_v33 = vmul.u32 43691, %v361_v23  ;;  %v313_v37 = vshrl.u32 %v2315_v18, 16  ;;  %v911_v57 = vld [vmem:[#allocation12 + $0xf8] sm:$0xff] }
  0x70   :  { %v293_v63 = vadd.s32 %v292_v43, %v282_v42  ;;  %727 = vmatpush.msrb.mxu0 %v648_v3  ;;  %v319_v24 = vsel %vm2332_vm5, 1, %v2094_v39  ;;  %v368_v42 = vshll.u32 %v2360_v31, 16  ;;  %v799_v43 = vld [vmem:[#allocation10 + $0x8] sm:$0xff]  ;;  %v2372_v53 = vld [vmem:[%s2608_s3] ss:$0 sm:$0xff] }
  0x71   :  { %759 = vmatpush.msrb.mxu1 %v664_v27  ;;  %829 = vmatpush.msrb.mxu2 %v802_v15  ;;  %v321_v20 = vadd.s32 %v319_v24, %v317_v4  ;;  %v371_v15 = vshrl.u32 %v2362_v36, 16 }
  0x72   :  { %586 = vmatmul.f32.gmra.mxu2 %v2268_v48  ;;  %v294_v14 = vadd.s32 %v293_v63, %v284_v62  ;;  %728 = vmatpush.msrb.mxu0 %v647_v9  ;;  %vm372_vm10 = vc.u32 %v364_v33, %v368_v42 }
  0x73   :  { %522 = vmatmul.f32.gmra.mxu0 %v431_v21  ;;  %v2318_v21 = vadd.s32 8, %v236_v13  ;;  %760 = vmatpush.msrb.mxu1 %v663_v32  ;;  %v800_v32 = vld [vmem:[#allocation10 + $0x10] sm:$0xff] }
  0x74   :  { %554 = vmatmul.f32.gmra.mxu1 %v436_v22  ;;  %v636_v22 = vld [vmem:[#allocation9 + $0x30] sm:$0xff]  ;;  %729 = vmatpush.msrb.mxu0 %v646_v17  ;;  %v295_v10 = vshrl.u32 %v294_v14, 4 }
  0x75   :  { %691 = vmatpush.msra.mxu3 %v636_v22  ;;  %v332_v40 = vand.u32 65535, %v2318_v21  ;;  %v333_v55 = vshrl.u32 %v2318_v21, 16  ;;  %761 = vmatpush.msrb.mxu1 %v662_v47  ;;  %v374_v47 = vadd.s32 %v368_v42, %v364_v33 }
  0x76   :  { %830 = vmatpush.msrb.mxu2 %v801_v26  ;;  %v296_v49 = vmul.u32 24, %v295_v10  ;;  %964 = vmatpush.msra.mxu0 %v911_v57  ;;  %v904_v57 = vld [vmem:[#allocation12 + $0xc0] sm:$0xff] }
  0x77   :  { %692 = vmatpush.msra.mxu3 %v635_v29  ;;  %v335_v59 = vmul.u32 43691, %v332_v40  ;;  %v2336_v60 = vmul.u32 43690, %v332_v40  ;;  %v2340_v1 = vmul.u32 43691, %v333_v55  ;;  %v338_v22 = vmul.u32 43690, %v333_v55 }
  0x78   :  { %v268_v29 = vsub.s32 %v2279_v25, %v267_v50  ;;  %v322_v40 = vadd.s32 %v321_v20, %v311_v19  ;;  %831 = vmatpush.msrb.mxu2 %v800_v32  ;;  %v798_v25 = vld [vmem:[#allocation10] sm:$0xff]  ;;  %v367_v55 = vmul.u32 43690, %v362_v28  ;;  %vm376_vm12 = vc.u32 %v374_v47, %v370_v45  ;;  %v907_v45 = vld [vmem:[#allocation12 + $0xd8] sm:$0xff] }
  0x79   :  { %693 = vmatpush.msra.mxu3 %v634_v44  ;;  %v339_v5 = vshll.u32 %v2336_v60, 16  ;;  %v341_v11 = vshll.u32 %v2340_v1, 16  ;;  %v340_v18 = vshrl.u32 %v2336_v60, 16  ;;  %v342_v61 = vshrl.u32 %v2340_v1, 16 }
  0x7a   :  { %vm387_vm8 = vcmp.ne.s32.totalorder %v268_v29, 0  ;;  %832 = vmatpush.msrb.mxu2 %v799_v43  ;;  %vm392_vm9 = vcmp.lt.s32.totalorder %v268_v29, 0  ;;  %v323_v51 = vadd.s32 %v322_v40, %v313_v37  ;;  %v402_v56 = vadd.s32 24, %v268_v29 }
  0x7b   :  { %694 = vmatpush.msra.mxu3 %v633_v46  ;;  %vm2349_vm6 = vc.u32 %v335_v59, %v339_v5  ;;  %v345_v13 = vadd.s32 %v339_v5, %v335_v59  ;;  %v373_v46 = vsel %vm372_vm10, 1, %v2094_v39  ;;  %vm2378_vm11 = vmand %vm392_vm9, %vm387_vm8  ;;  %v297_v59 = vsub.s32 %v2287_v38, %v296_v49 }
  0x7c   :  { %v344_v27 = vsel %vm2349_vm6, 1, %v2094_v39  ;;  %833 = vmatpush.msrb.mxu2 %v798_v25  ;;  %v324_v60 = vshrl.u32 %v323_v51, 4  ;;  %v375_v63 = vadd.s32 %v373_v46, %v367_v55  ;;  %v407_v3 = vsel %vm2378_vm11, %v402_v56, %v268_v29  ;;  %v888_v56 = vld [vmem:[#allocation12 + $0x40] sm:$0xff] }
  0x7d   :  { %695 = vmatpush.msra.mxu3 %v632_v2  ;;  %vm347_vm7 = vc.u32 %v345_v13, %v341_v11  ;;  %v346_v41 = vadd.s32 %v344_v27, %v338_v22  ;;  %834 = vmatmul.f32.vlgmr.msrb.gmra.mxu2 %v2259_v30  ;;  %v377_v4 = vsel %vm376_vm12, 1, %v2094_v39  ;;  %vm388_vm13 = vcmp.ne.s32.totalorder %v297_v59, 0 }
  0x7e   :  { %v348_v44 = vsel %vm347_vm7, 1, %v2094_v39  ;;  %vm393_vm14 = vcmp.lt.s32.totalorder %v297_v59, 0  ;;  %v325_v6 = vmul.u32 24, %v324_v60  ;;  %vm412_vm15 = vcmp.ge.s32.totalorder %v407_v3, 8  ;;  %v893_v60 = vld [vmem:[#allocation12 + $0x68] sm:$0xff] }
  0x7f   :  { %696 = vmatpush.msra.mxu3 %v631_v8  ;;  %v350_v52 = vadd.s32 %v348_v44, %v346_v41  ;;  %v369_v38 = vshrl.u32 %v2360_v31, 16  ;;  %v379_v1 = vadd.s32 %v377_v4, %v375_v63  ;;  %v403_v8 = vadd.s32 24, %v297_v59  ;;  %vm2390_vm0 = vmand %vm393_vm14, %vm388_vm13  ;;  %v892_v4 = vld [vmem:[#allocation12 + $0x60] sm:$0xff] }
  0x80   :  { %v2395_v39 = vsel %vm412_vm15, 1.0, %v2093_v0  ;;  %v326_v13 = vsub.s32 %v2299_v54, %v325_v6 }
  0x81   :  { %697 = vmatpush.msra.mxu3 %v630_v16  ;;  %v351_v62 = vadd.s32 %v350_v52, %v340_v18  ;;  %v380_v17 = vadd.s32 %v379_v1, %v369_v38  ;;  %v408_v20 = vsel %vm2390_vm0, %v403_v8, %v297_v59  ;;  %v895_v18 = vld [vmem:[#allocation12 + $0x78] sm:$0xff]  ;;  %v894_v52 = vld [vmem:[#allocation12 + $0x70] sm:$0xff] }
  0x82   :  { %vm389_vm2 = vcmp.ne.s32.totalorder %v326_v13, 0  ;;  %vm394_vm3 = vcmp.lt.s32.totalorder %v326_v13, 0  ;;  %vm413_vm4 = vcmp.ge.s32.totalorder %v408_v20, 8  ;;  %v404_v29 = vadd.s32 24, %v326_v13  ;;  %v891_v1 = vld [vmem:[#allocation12 + $0x58] sm:$0xff] }
  0x83   :  { %v352_v24 = vadd.s32 %v351_v62, %v342_v61  ;;  %v381_v54 = vadd.s32 %v380_v17, %v371_v15  ;;  %vm399_vm5 = vmand %vm394_vm3, %vm389_vm2  ;;  %v2405_v10 = vsel %vm413_vm4, 1.0, %v2093_v0  ;;  %932 = vmatpush.msrb.mxu3 %v895_v18  ;;  %v910_v61 = vld [vmem:[#allocation12 + $0xf0] sm:$0xff] }
  0x84   :  { %v409_v42 = vsel %vm399_vm5, %v404_v29, %v326_v13  ;;  %v926_v62 = vld [vmem:[#allocation12 + $0x170] sm:$0xff]  ;;  %965 = vmatpush.msra.mxu0 %v910_v61  ;;  %v915_v61 = vld [vmem:[#allocation12 + $0x118] sm:$0xff] }
  0x85   :  { %837 = vmatmul.f32.gmra.mxu2 %v2262_v34  ;;  %v353_v14 = vshrl.u32 %v352_v24, 4  ;;  %v382_v40 = vshrl.u32 %v381_v54, 4  ;;  %vm2410_vm9 = vcmp.ge.s32.totalorder %v409_v42, 8  ;;  %933 = vmatpush.msrb.mxu3 %v894_v52  ;;  %v890_v42 = vld [vmem:[#allocation12 + $0x50] sm:$0xff]  ;;  %v905_v52 = vld [vmem:[#allocation12 + $0xc8] sm:$0xff] }
  0x86   :  { %v918_v18 = vld [vmem:[#allocation12 + $0x130] sm:$0xff] }
  0x87   :  { %v354_v27 = vmul.u32 24, %v353_v14  ;;  %934 = vmatpush.msrb.mxu3 %v893_v60  ;;  %v903_v60 = vld [vmem:[#allocation12 + $0xb8] sm:$0xff] }
  0x89   :  { %v355_v33 = vsub.s32 %v2318_v21, %v354_v27  ;;  %v383_v21 = vmul.u32 24, %v382_v40  ;;  %935 = vmatpush.msrb.mxu3 %v892_v4  ;;  %v923_v40 = vld [vmem:[#allocation12 + $0x158] sm:$0xff]  ;;  %v884_v4 = vld [vmem:[#allocation12 + $0x20] sm:$0xff] }
  0x8b   :  { %vm390_vm7 = vcmp.ne.s32.totalorder %v355_v33, 0  ;;  %vm395_vm8 = vcmp.lt.s32.totalorder %v355_v33, 0  ;;  %v405_v46 = vadd.s32 24, %v355_v33  ;;  %936 = vmatpush.msrb.mxu3 %v891_v1  ;;  %v882_v1 = vld [vmem:[#allocation12 + $0x10] sm:$0xff] }
  0x8c   :  { %vm2415_vm10 = vmand %vm395_vm8, %vm390_vm7 }
  0x8d   :  { %840 = vmatmul.f32.gmra.mxu2 %v2093_v0  ;;  %v410_v24 = vsel %vm2415_vm10, %v405_v46, %v355_v33  ;;  %937 = vmatpush.msrb.mxu3 %v890_v42  ;;  %v887_v46 = vld [vmem:[#allocation12 + $0x38] sm:$0xff] }
  0x8e   :  { %vm415_vm14 = vcmp.ge.s32.totalorder %v410_v24, 8  ;;  %v883_v24 = vld [vmem:[#allocation12 + $0x18] sm:$0xff] }
  0x8f   :  { %v2431_v13 = vsel %vm415_vm14, 1.0, %v2093_v0 }
  0x95   :  { %843 = vmatmul.f32.gmra.mxu2 %v2265_v35  ;;  %v2422_v35 = vsel %vm2410_vm9, 1.0, %v2093_v0  ;;  %v2435_v0 = vld [vmem:[#allocation2] sm:$0xff] }
  0x9d   :  { %846 = vmatmul.f32.gmra.mxu2 %v2268_v48 }
  0xd0   :  { %v511_v58 = vpop.f32.mrf.mxu0 }
  0xd1   :  { %v512_v30 = vadd.f32 %v2372_v53, %v511_v58  ;;  %v543_v2 = vpop.f32.mrf.mxu1  ;;  %v927_v58 = vld [vmem:[#allocation12 + $0x178] sm:$0xff] }
  0xd2   :  { %996 = vmatpush.msra.mxu1 %v927_v58  ;;  %v916_v58 = vld [vmem:[#allocation12 + $0x120] sm:$0xff] }
  0xd3   :  { %v544_v5 = vadd.f32 %v543_v2, %v512_v30  ;;  %v384_v2 = vsub.s32 %v2346_v7, %v383_v21  ;;  %v919_v21 = vld [vmem:[#allocation12 + $0x138] sm:$0xff] }
  0xd4   :  { %997 = vmatpush.msra.mxu1 %v926_v62  ;;  %v902_v62 = vld [vmem:[#allocation12 + $0xb0] sm:$0xff] }
  0xd5   :  { %v575_v50 = vpop.f32.mrf.mxu2  ;;  %vm391_vm12 = vcmp.ne.s32.totalorder %v384_v2, 0  ;;  %vm396_vm13 = vcmp.lt.s32.totalorder %v384_v2, 0  ;;  %v406_v11 = vadd.s32 24, %v384_v2 }
  0xd6   :  { %v576_v9 = vadd.f32 %v575_v50, %v544_v5  ;;  %vm401_vm15 = vmand %vm396_vm13, %vm391_vm12 }
  0xd7   :  { %v411_v17 = vsel %vm401_vm15, %v406_v11, %v384_v2  ;;  %v901_v2 = vld [vmem:[#allocation12 + $0xa8] sm:$0xff]  ;;  %v896_v11 = vld [vmem:[#allocation12 + $0x80] sm:$0xff] }
  0xd8   :  { %v514_v12 = vpop.f32.mrf.mxu0  ;;  %vm590_vm1 = vcmp.ge.f32.partialorder %v576_v9, 0.0  ;;  %v595_v34 = vmul.f32 0.01, %v576_v9 }
  0xd9   :  { %v515_v16 = vadd.f32 %v2372_v53, %v514_v12  ;;  %v546_v19 = vpop.f32.mrf.mxu1 }
  0xda   :  { %v600_v22 = vsel %vm590_vm1, %v576_v9, %v595_v34  ;;  %vm416_vm1 = vcmp.ge.s32.totalorder %v411_v17, 8  ;;  %v2450_v17 = vld [vmem:[%s2579_s6] ss:$0 sm:$0xff] }
  0xdb   :  { %v547_v23 = vadd.f32 %v546_v19, %v515_v16  ;;  %v605_v26 = vmul.f32 %v2395_v39, %v600_v22  ;;  %v2438_v27 = vsel %vm416_vm1, 1.0, %v2435_v0 }
  0xdd   :  { %610 = vst [vmem:[#allocation3 + $0x8] sm:$0xff] %v605_v26  ;;  %v578_v28 = vpop.f32.mrf.mxu2  ;;  %762 = vmatmul.f32.vlgmr.msrb.gmra.mxu1 %v605_v26 }
  0xde   :  { %v579_v31 = vadd.f32 %v578_v28, %v547_v23 }
  0xe0   :  { %v517_v32 = vpop.f32.mrf.mxu0  ;;  %vm591_vm6 = vcmp.ge.f32.partialorder %v579_v31, 0.0  ;;  %v596_v36 = vmul.f32 0.01, %v579_v31 }
  0xe1   :  { %v518_v37 = vadd.f32 %v2372_v53, %v517_v32  ;;  %v549_v41 = vpop.f32.mrf.mxu1 }
  0xe2   :  { %v601_v43 = vsel %vm591_vm6, %v579_v31, %v596_v36  ;;  %v925_v36 = vld [vmem:[#allocation12 + $0x168] sm:$0xff] }
  0xe3   :  { %v550_v44 = vadd.f32 %v549_v41, %v518_v37  ;;  %v606_v25 = vmul.f32 %v2405_v10, %v601_v43  ;;  %998 = vmatpush.msra.mxu1 %v925_v36  ;;  %v924_v37 = vld [vmem:[#allocation12 + $0x160] sm:$0xff]  ;;  %v922_v41 = vld [vmem:[#allocation12 + $0x150] sm:$0xff]  ;;  %v909_v43 = vld [vmem:[#allocation12 + $0xe8] sm:$0xff] }
  0xe4   :  { %v615_v47 = vld [vmem:[#allocation3 + $0x6] sm:$0xff]  ;;  %966 = vmatpush.msra.mxu0 %v909_v43 }
  0xe5   :  { %v620_v49 = vld [vmem:[#allocation3 + $0x7] sm:$0xff]  ;;  %611 = vst [vmem:[#allocation3 + $0x10] sm:$0xff] %v606_v25  ;;  %v581_v51 = vpop.f32.mrf.mxu2  ;;  %698 = vmatmul.f32.vlgmr.msra.gmra.mxu3 %v615_v47  ;;  %765 = vmatmul.f32.gmra.mxu1 %v606_v25  ;;  %v908_v25 = vld [vmem:[#allocation12 + $0xe0] sm:$0xff]  ;;  %v921_v47 = vld [vmem:[#allocation12 + $0x148] sm:$0xff] }
  0xe6   :  { %730 = vmatmul.f32.vlgmr.msrb.gmra.mxu0 %v620_v49  ;;  %v582_v55 = vadd.f32 %v581_v51, %v550_v44  ;;  %999 = vmatpush.msra.mxu1 %v924_v37  ;;  %v889_v44 = vld [vmem:[#allocation12 + $0x48] sm:$0xff]  ;;  %v920_v49 = vld [vmem:[#allocation12 + $0x140] sm:$0xff]  ;;  %v906_v51 = vld [vmem:[#allocation12 + $0xd0] sm:$0xff] }
  0xe7   :  { %938 = vmatpush.msrb.mxu3 %v889_v44  ;;  %967 = vmatpush.msra.mxu0 %v908_v25 }
  0xe8   :  { %v520_v59 = vpop.f32.mrf.mxu0  ;;  %vm592_vm11 = vcmp.ge.f32.partialorder %v582_v55, 0.0  ;;  %v597_v30 = vmul.f32 0.01, %v582_v55  ;;  %1000 = vmatpush.msra.mxu1 %v923_v40 }
  0xe9   :  { %v521_v63 = vadd.f32 %v2372_v53, %v520_v59  ;;  %v552_v3 = vpop.f32.mrf.mxu1  ;;  %968 = vmatpush.msra.mxu0 %v907_v45  ;;  %939 = vmatpush.msrb.mxu3 %v888_v56  ;;  %v886_v59 = vld [vmem:[#allocation12 + $0x30] sm:$0xff] }
  0xea   :  { %v602_v5 = vsel %vm592_vm11, %v582_v55, %v597_v30  ;;  %1001 = vmatpush.msra.mxu1 %v922_v41  ;;  %v917_v55 = vld [vmem:[#allocation12 + $0x128] sm:$0xff]  ;;  %v914_v30 = vld [vmem:[#allocation12 + $0x110] sm:$0xff] }
  0xeb   :  { %v553_v6 = vadd.f32 %v552_v3, %v521_v63  ;;  %v607_v38 = vmul.f32 %v2422_v35, %v602_v5  ;;  %969 = vmatpush.msra.mxu0 %v906_v51  ;;  %940 = vmatpush.msrb.mxu3 %v887_v46  ;;  %v885_v63 = vld [vmem:[#allocation12 + $0x28] sm:$0xff]  ;;  %v900_v5 = vld [vmem:[#allocation12 + $0xa0] sm:$0xff]  ;;  %v1083_v46 = vld [vmem:[#allocation13 + $0x78] sm:$0xff] }
  0xec   :  { %v616_v50 = vld [vmem:[#allocation3 + $0xe] sm:$0xff]  ;;  %1002 = vmatpush.msra.mxu1 %v921_v47  ;;  %v913_v3 = vld [vmem:[#allocation12 + $0x108] sm:$0xff]  ;;  %1120 = vmatpush.msra.mxu2 %v1083_v46 }
  0xed   :  { %v621_v8 = vld [vmem:[#allocation3 + $0xf] sm:$0xff]  ;;  %612 = vst [vmem:[#allocation3 + $0x18] sm:$0xff] %v607_v38  ;;  %v584_v7 = vpop.f32.mrf.mxu2  ;;  %701 = vmatmul.f32.gmra.mxu3 %v616_v50  ;;  %768 = vmatmul.f32.gmra.mxu1 %v607_v38  ;;  %v898_v50 = vld [vmem:[#allocation12 + $0x90] sm:$0xff]  ;;  %v1093_v46 = vld [vmem:[#allocation13 + $0xc8] sm:$0xff] }
  0xee   :  { %733 = vmatmul.f32.gmra.mxu0 %v621_v8  ;;  %v585_v9 = vadd.f32 %v584_v7, %v553_v6  ;;  %1003 = vmatpush.msra.mxu1 %v920_v49  ;;  %v912_v6 = vld [vmem:[#allocation12 + $0x100] sm:$0xff]  ;;  %v899_v38 = vld [vmem:[#allocation12 + $0x98] sm:$0xff]  ;;  %v881_v8 = vld [vmem:[#allocation12 + $0x8] sm:$0xff] }
  0xef   :  { %970 = vmatpush.msra.mxu0 %v905_v52  ;;  %941 = vmatpush.msrb.mxu3 %v886_v59  ;;  %v897_v7 = vld [vmem:[#allocation12 + $0x88] sm:$0xff] }
  0xf0   :  { %v523_v12 = vpop.f32.mrf.mxu0  ;;  %vm593_vm0 = vcmp.ge.f32.partialorder %v585_v9, 0.0  ;;  %v598_v14 = vmul.f32 0.01, %v585_v9  ;;  %1004 = vmatpush.msra.mxu1 %v919_v21 }
  0xf1   :  { %v524_v15 = vadd.f32 %v2372_v53, %v523_v12  ;;  %v555_v48 = vpop.f32.mrf.mxu1  ;;  %971 = vmatpush.msra.mxu0 %v904_v57  ;;  %942 = vmatpush.msrb.mxu3 %v885_v63  ;;  %v1099_v57 = vld [vmem:[#allocation13 + $0xf8] sm:$0xff] }
  0xf2   :  { %v603_v34 = vsel %vm593_vm0, %v585_v9, %v598_v14  ;;  %1005 = vmatpush.msra.mxu1 %v918_v18  ;;  %v880_v9 = vld [vmem:[#allocation12] sm:$0xff]  ;;  %v1115_v63 = vld [vmem:[#allocation13 + $0x178] sm:$0xff] }
  0xf3   :  { %v556_v16 = vadd.f32 %v555_v48, %v524_v15  ;;  %v608_v19 = vmul.f32 %v2431_v13, %v603_v34  ;;  %972 = vmatpush.msra.mxu0 %v903_v60  ;;  %943 = vmatpush.msrb.mxu3 %v884_v4  ;;  %v2444_v48 = vld [vmem:[%s2577_s4] ss:$0 sm:$0xff]  ;;  %v1098_v60 = vld [vmem:[#allocation13 + $0xf0] sm:$0xff] }
  0xf4   :  { %v617_v20 = vld [vmem:[#allocation3 + $0x16] sm:$0xff]  ;;  %1006 = vmatpush.msra.mxu1 %v917_v55 }
  0xf5   :  { %v622_v22 = vld [vmem:[#allocation3 + $0x17] sm:$0xff]  ;;  %613 = vst [vmem:[#allocation3 + $0x20] sm:$0xff] %v608_v19  ;;  %v587_v23 = vpop.f32.mrf.mxu2  ;;  %704 = vmatmul.f32.gmra.mxu3 %v617_v20  ;;  %771 = vmatmul.f32.gmra.mxu1 %v608_v19 }
  0xf6   :  { %736 = vmatmul.f32.gmra.mxu0 %v622_v22  ;;  %v588_v26 = vadd.f32 %v587_v23, %v556_v16  ;;  %1007 = vmatpush.msra.mxu1 %v916_v58  ;;  %v1082_v58 = vld [vmem:[#allocation13 + $0x70] sm:$0xff] }
  0xf7   :  { %973 = vmatpush.msra.mxu0 %v902_v62  ;;  %944 = vmatpush.msrb.mxu3 %v883_v24 }
  0xf8   :  { %vm594_vm2 = vcmp.ge.f32.partialorder %v588_v26, 0.0  ;;  %v599_v53 = vmul.f32 0.01, %v588_v26  ;;  %1008 = vmatpush.msra.mxu1 %v915_v61  ;;  %1121 = vmatpush.msra.mxu2 %v1082_v58  ;;  %v1108_v58 = vld [vmem:[#allocation13 + $0x140] sm:$0xff] }
  0xf9   :  { %974 = vmatpush.msra.mxu0 %v901_v2  ;;  %945 = vmatpush.msrb.mxu3 %v882_v1  ;;  %v1080_v1 = vld [vmem:[#allocation13 + $0x60] sm:$0xff] }
  0xfa   :  { %v604_v54 = vsel %vm594_vm2, %v588_v26, %v599_v53  ;;  %1009 = vmatpush.msra.mxu1 %v914_v30  ;;  %v1081_v30 = vld [vmem:[#allocation13 + $0x68] sm:$0xff] }
  0xfb   :  { %v609_v28 = vmul.f32 %v2438_v27, %v604_v54  ;;  %975 = vmatpush.msra.mxu0 %v900_v5  ;;  %946 = vmatpush.msrb.mxu3 %v881_v8  ;;  %v1097_v5 = vld [vmem:[#allocation13 + $0xe8] sm:$0xff] }
  0xfc   :  { %v618_v29 = vld [vmem:[#allocation3 + $0x1e] sm:$0xff]  ;;  %1010 = vmatpush.msra.mxu1 %v913_v3  ;;  %1122 = vmatpush.msra.mxu2 %v1081_v30  ;;  %v1104_v30 = vld [vmem:[#allocation13 + $0x120] sm:$0xff] }
  0xfd   :  { %v623_v31 = vld [vmem:[#allocation3 + $0x1f] sm:$0xff]  ;;  %614 = vst [vmem:[#allocation3 + $0x28] sm:$0xff] %v609_v28  ;;  %707 = vmatmul.f32.gmra.mxu3 %v618_v29  ;;  %774 = vmatmul.f32.gmra.mxu1 %v609_v28 }
  0xfe   :  { %739 = vmatmul.f32.gmra.mxu0 %v623_v31  ;;  %1011 = vmatpush.msra.mxu1 %v912_v6  ;;  %v1114_v6 = vld [vmem:[#allocation13 + $0x170] sm:$0xff] }
  0xff   :  { %976 = vmatpush.msra.mxu0 %v899_v38  ;;  %947 = vmatpush.msrb.mxu3 %v880_v9  ;;  %v1079_v9 = vld [vmem:[#allocation13 + $0x58] sm:$0xff] }
 0x100   :  { %v835_v14 = vpop.f32.mrf.mxu2  ;;  %1123 = vmatpush.msra.mxu2 %v1080_v1  ;;  %v1101_v1 = vld [vmem:[#allocation13 + $0x108] sm:$0xff] }
 0x101   :  { %977 = vmatpush.msra.mxu0 %v898_v50  ;;  %v836_v53 = vadd.f32 %v2450_v17, %v835_v14  ;;  %1152 = vmatpush.msra.mxu3 %v1099_v57  ;;  %v1113_v50 = vld [vmem:[#allocation13 + $0x168] sm:$0xff]  ;;  %v1076_v57 = vld [vmem:[#allocation13 + $0x40] sm:$0xff] }
 0x102   :  { %1124 = vmatpush.msra.mxu2 %v1079_v9  ;;  %v1100_v9 = vld [vmem:[#allocation13 + $0x100] sm:$0xff] }
 0x103   :  { %978 = vmatpush.msra.mxu0 %v897_v7  ;;  %1153 = vmatpush.msra.mxu3 %v1098_v60  ;;  %v1106_v60 = vld [vmem:[#allocation13 + $0x130] sm:$0xff] }
 0x104   :  { %v619_v32 = vld [vmem:[#allocation3 + $0x26] sm:$0xff] }
 0x105   :  { %v624_v33 = vld [vmem:[#allocation3 + $0x27] sm:$0xff]  ;;  %710 = vmatmul.f32.gmra.mxu3 %v619_v32  ;;  %979 = vmatpush.msra.mxu0 %v896_v11 }
 0x106   :  { %742 = vmatmul.f32.gmra.mxu0 %v624_v33  ;;  %1154 = vmatpush.msra.mxu3 %v1097_v5  ;;  %v1090_v5 = vld [vmem:[#allocation13 + $0xb0] sm:$0xff] }
 0x107   :  { %1184 = vmatpush.msrb.mxu0 %v1115_v63  ;;  %v1075_v63 = vld [vmem:[#allocation13 + $0x38] sm:$0xff] }
 0x108   :  { %v838_v23 = vpop.f32.mrf.mxu2 }
 0x109   :  { %v839_v41 = vadd.f32 %v2450_v17, %v838_v23  ;;  %1185 = vmatpush.msrb.mxu0 %v1114_v6  ;;  %v1102_v6 = vld [vmem:[#allocation13 + $0x110] sm:$0xff] }
 0x10b   :  { %1186 = vmatpush.msrb.mxu0 %v1113_v50  ;;  %v1072_v50 = vld [vmem:[#allocation13 + $0x20] sm:$0xff] }
 0x110   :  { %v841_v43 = vpop.f32.mrf.mxu2 }
 0x111   :  { %v842_v56 = vadd.f32 %v2450_v17, %v841_v43 }
 0x118   :  { %v844_v4 = vpop.f32.mrf.mxu2 }
 0x15a   :  { %v763_v15 = vpop.f32.mrf.mxu1 }
 0x162   :  { %v766_v26 = vpop.f32.mrf.mxu1 }
 0x163   :  { %v731_v12 = vpop.f32.mrf.mxu0 }
 0x168   :  { %v699_v34 = vpop.f32.mrf.mxu3 }
 0x169   :  { %v700_v16 = vadd.f32 %v2444_v48, %v699_v34  ;;  %v845_v34 = vadd.f32 %v2450_v17, %v844_v4  ;;  %v1074_v4 = vld [vmem:[#allocation13 + $0x30] sm:$0xff] }
 0x16a   :  { %v769_v44 = vpop.f32.mrf.mxu1 }
 0x16b   :  { %v732_v19 = vadd.f32 %v731_v12, %v700_v16  ;;  %v734_v20 = vpop.f32.mrf.mxu0  ;;  %v1078_v16 = vld [vmem:[#allocation13 + $0x50] sm:$0xff] }
 0x16c   :  { %1125 = vmatpush.msra.mxu2 %v1078_v16  ;;  %v1085_v16 = vld [vmem:[#allocation13 + $0x88] sm:$0xff] }
 0x16d   :  { %v764_v22 = vadd.f32 %v763_v15, %v732_v19  ;;  %v1096_v15 = vld [vmem:[#allocation13 + $0xe0] sm:$0xff] }
 0x16e   :  { %1155 = vmatpush.msra.mxu3 %v1096_v15  ;;  %v1086_v15 = vld [vmem:[#allocation13 + $0x90] sm:$0xff] }
 0x16f   :  { %vm778_vm3 = vcmp.ge.f32.partialorder %v764_v22, 0.0  ;;  %v783_v54 = vmul.f32 0.01, %v764_v22 }
 0x170   :  { %v702_v28 = vpop.f32.mrf.mxu3 }
 0x171   :  { %v788_v29 = vsel %vm778_vm3, %v764_v22, %v783_v54  ;;  %v703_v31 = vadd.f32 %v2444_v48, %v702_v28 }
 0x172   :  { %v850_v32 = vadd.f32 %v836_v53, %v788_v29  ;;  %v772_v24 = vpop.f32.mrf.mxu1  ;;  %v847_v29 = vpop.f32.mrf.mxu2 }
 0x173   :  { %v735_v33 = vadd.f32 %v734_v20, %v703_v31  ;;  %v737_v40 = vpop.f32.mrf.mxu0  ;;  %v1095_v20 = vld [vmem:[#allocation13 + $0xd8] sm:$0xff] }
 0x174   :  { %v2455_v36 = vmul.f32 %v2395_v39, %v850_v32  ;;  %1156 = vmatpush.msra.mxu3 %v1095_v20  ;;  %v1084_v20 = vld [vmem:[#allocation13 + $0x80] sm:$0xff] }
 0x175   :  { %v767_v37 = vadd.f32 %v766_v26, %v735_v33 }
 0x176   :  { %860 = vst [vmem:[#allocation3 + $0x8] sm:$0xff] %v2455_v36  ;;  %1012 = vmatmul.f32.vlgmr.msra.gmra.mxu1 %v2455_v36 }
 0x177   :  { %vm779_vm4 = vcmp.ge.f32.partialorder %v767_v37, 0.0  ;;  %v784_v42 = vmul.f32 0.01, %v767_v37 }
 0x178   :  { %v705_v25 = vpop.f32.mrf.mxu3 }
 0x179   :  { %v789_v45 = vsel %vm779_vm4, %v767_v37, %v784_v42  ;;  %v706_v47 = vadd.f32 %v2444_v48, %v705_v25 }
 0x17a   :  { %v851_v49 = vadd.f32 %v839_v41, %v789_v45  ;;  %v775_v31 = vpop.f32.mrf.mxu1  ;;  %v848_v41 = vadd.f32 %v2450_v17, %v847_v29  ;;  %v1112_v17 = vld [vmem:[#allocation13 + $0x160] sm:$0xff] }
 0x17b   :  { %v738_v21 = vadd.f32 %v737_v40, %v706_v47  ;;  %v740_v61 = vpop.f32.mrf.mxu0  ;;  %1187 = vmatpush.msrb.mxu0 %v1112_v17 }
 0x17c   :  { %v2462_v51 = vmul.f32 %v2405_v10, %v851_v49 }
 0x17d   :  { %v770_v18 = vadd.f32 %v769_v44, %v738_v21  ;;  %v865_v52 = vld [vmem:[#allocation3 + $0x4] sm:$0xff] }
 0x17e   :  { %v870_v55 = vld [vmem:[#allocation3 + $0x6] sm:$0xff]  ;;  %861 = vst [vmem:[#allocation3 + $0x10] sm:$0xff] %v2462_v51  ;;  %948 = vmatmul.f32.vlgmr.msrb.gmra.mxu3 %v865_v52  ;;  %1015 = vmatmul.f32.gmra.mxu1 %v2462_v51  ;;  %v1109_v52 = vld [vmem:[#allocation13 + $0x148] sm:$0xff] }
 0x17f   :  { %980 = vmatmul.f32.vlgmr.msra.gmra.mxu0 %v870_v55  ;;  %vm780_vm5 = vcmp.ge.f32.partialorder %v770_v18, 0.0  ;;  %v785_v59 = vmul.f32 0.01, %v770_v18  ;;  %v1111_v21 = vld [vmem:[#allocation13 + $0x158] sm:$0xff]  ;;  %v1077_v55 = vld [vmem:[#allocation13 + $0x48] sm:$0xff] }
 0x180   :  { %v708_v62 = vpop.f32.mrf.mxu3  ;;  %1188 = vmatpush.msrb.mxu0 %v1111_v21  ;;  %1126 = vmatpush.msra.mxu2 %v1077_v55 }
 0x181   :  { %v790_v2 = vsel %vm780_vm5, %v770_v18, %v785_v59  ;;  %v709_v3 = vadd.f32 %v2444_v48, %v708_v62  ;;  %v1110_v18 = vld [vmem:[#allocation13 + $0x150] sm:$0xff]  ;;  %v1107_v59 = vld [vmem:[#allocation13 + $0x138] sm:$0xff]  ;;  %v1092_v62 = vld [vmem:[#allocation13 + $0xc0] sm:$0xff] }
 0x182   :  { %v852_v38 = vadd.f32 %v842_v56, %v790_v2  ;;  %1189 = vmatpush.msrb.mxu0 %v1110_v18  ;;  %v1094_v56 = vld [vmem:[#allocation13 + $0xd0] sm:$0xff]  ;;  %1127 = vmatpush.msra.mxu2 %v1076_v57  ;;  %v1091_v2 = vld [vmem:[#allocation13 + $0xb8] sm:$0xff] }
 0x183   :  { %v741_v8 = vadd.f32 %v740_v61, %v709_v3  ;;  %v743_v53 = vpop.f32.mrf.mxu0  ;;  %1157 = vmatpush.msra.mxu3 %v1094_v56  ;;  %v1105_v61 = vld [vmem:[#allocation13 + $0x128] sm:$0xff]  ;;  %v1103_v3 = vld [vmem:[#allocation13 + $0x118] sm:$0xff] }
 0x184   :  { %v2469_v7 = vmul.f32 %v2422_v35, %v852_v38  ;;  %1190 = vmatpush.msrb.mxu0 %v1109_v52  ;;  %1128 = vmatpush.msra.mxu2 %v1075_v63  ;;  %v1089_v38 = vld [vmem:[#allocation13 + $0xa8] sm:$0xff]  ;;  %v1297_v57 = vld [vmem:[#allocation15 + $0xf8] sm:$0xff]  ;;  %v1312_v63 = vld [vmem:[#allocation15 + $0x170] sm:$0xff] }
 0x185   :  { %v773_v11 = vadd.f32 %v772_v24, %v741_v8  ;;  %v866_v12 = vld [vmem:[#allocation3 + $0xc] sm:$0xff]  ;;  %1158 = vmatpush.msra.mxu3 %v1093_v46  ;;  %v1073_v24 = vld [vmem:[#allocation13 + $0x28] sm:$0xff] }
 0x186   :  { %v871_v14 = vld [vmem:[#allocation3 + $0xe] sm:$0xff]  ;;  %862 = vst [vmem:[#allocation3 + $0x18] sm:$0xff] %v2469_v7  ;;  %951 = vmatmul.f32.gmra.mxu3 %v866_v12  ;;  %1018 = vmatmul.f32.gmra.mxu1 %v2469_v7 }
 0x187   :  { %983 = vmatmul.f32.gmra.mxu0 %v871_v14  ;;  %vm781_vm6 = vcmp.ge.f32.partialorder %v773_v11, 0.0  ;;  %v786_v19 = vmul.f32 0.01, %v773_v11  ;;  %1159 = vmatpush.msra.mxu3 %v1092_v62  ;;  %v1088_v8 = vld [vmem:[#allocation13 + $0xa0] sm:$0xff]  ;;  %v1087_v12 = vld [vmem:[#allocation13 + $0x98] sm:$0xff]  ;;  %v1070_v14 = vld [vmem:[#allocation13 + $0x10] sm:$0xff] }
 0x188   :  { %v711_v22 = vpop.f32.mrf.mxu3  ;;  %1191 = vmatpush.msrb.mxu0 %v1108_v58  ;;  %1129 = vmatpush.msra.mxu2 %v1074_v4  ;;  %v1281_v58 = vld [vmem:[#allocation15 + $0x78] sm:$0xff]  ;;  %v1296_v62 = vld [vmem:[#allocation15 + $0xf0] sm:$0xff]  ;;  %v1311_v4 = vld [vmem:[#allocation15 + $0x168] sm:$0xff] }
 0x189   :  { %v791_v23 = vsel %vm781_vm6, %v773_v11, %v786_v19  ;;  %v712_v26 = vadd.f32 %v2444_v48, %v711_v22  ;;  %1160 = vmatpush.msra.mxu3 %v1091_v2  ;;  %v1071_v11 = vld [vmem:[#allocation13 + $0x18] sm:$0xff]  ;;  %v1068_v19 = vld [vmem:[#allocation13] sm:$0xff]  ;;  %1318 = vmatpush.msrb.mxu1 %v1281_v58  ;;  %v1271_v58 = vld [vmem:[#allocation15 + $0x28] sm:$0xff] }
 0x18a   :  { %v853_v54 = vadd.f32 %v845_v34, %v791_v23  ;;  %1192 = vmatpush.msrb.mxu0 %v1107_v59  ;;  %1130 = vmatpush.msra.mxu2 %v1073_v24  ;;  %v1069_v34 = vld [vmem:[#allocation13 + $0x8] sm:$0xff]  ;;  %v1313_v59 = vld [vmem:[#allocation15 + $0x178] sm:$0xff]  ;;  %v1294_v24 = vld [vmem:[#allocation15 + $0xe0] sm:$0xff] }
 0x18b   :  { %v744_v28 = vadd.f32 %v743_v53, %v712_v26  ;;  %1161 = vmatpush.msra.mxu3 %v1090_v5  ;;  %v2489_v26 = vld [vmem:[%s2581_s8] ss:$0 sm:$0xff] }
 0x18c   :  { %v2476_v32 = vmul.f32 %v2431_v13, %v853_v54  ;;  %1193 = vmatpush.msrb.mxu0 %v1106_v60  ;;  %1131 = vmatpush.msra.mxu2 %v1072_v50 }
 0x18d   :  { %v776_v33 = vadd.f32 %v775_v31, %v744_v28  ;;  %v867_v37 = vld [vmem:[#allocation3 + $0x14] sm:$0xff]  ;;  %1162 = vmatpush.msra.mxu3 %v1089_v38 }
 0x18e   :  { %v872_v40 = vld [vmem:[#allocation3 + $0x16] sm:$0xff]  ;;  %863 = vst [vmem:[#allocation3 + $0x20] sm:$0xff] %v2476_v32  ;;  %954 = vmatmul.f32.gmra.mxu3 %v867_v37  ;;  %1021 = vmatmul.f32.gmra.mxu1 %v2476_v32 }
 0x18f   :  { %986 = vmatmul.f32.gmra.mxu0 %v872_v40  ;;  %vm782_vm7 = vcmp.ge.f32.partialorder %v776_v33, 0.0  ;;  %v787_v48 = vmul.f32 0.01, %v776_v33  ;;  %1163 = vmatpush.msra.mxu3 %v1088_v8 }
 0x190   :  { %1194 = vmatpush.msrb.mxu0 %v1105_v61  ;;  %1132 = vmatpush.msra.mxu2 %v1071_v11  ;;  %v1280_v61 = vld [vmem:[#allocation15 + $0x70] sm:$0xff]  ;;  %v1293_v11 = vld [vmem:[#allocation15 + $0xd8] sm:$0xff] }
 0x191   :  { %v792_v42 = vsel %vm782_vm7, %v776_v33, %v787_v48  ;;  %1164 = vmatpush.msra.mxu3 %v1087_v12  ;;  %1319 = vmatpush.msrb.mxu1 %v1280_v61  ;;  %v1305_v61 = vld [vmem:[#allocation15 + $0x138] sm:$0xff] }
 0x192   :  { %v854_v43 = vadd.f32 %v848_v41, %v792_v42  ;;  %1195 = vmatpush.msrb.mxu0 %v1104_v30  ;;  %1133 = vmatpush.msra.mxu2 %v1070_v14  ;;  %v1295_v30 = vld [vmem:[#allocation15 + $0xe8] sm:$0xff] }
 0x193   :  { %1165 = vmatpush.msra.mxu3 %v1086_v15 }
 0x194   :  { %v2482_v44 = vmul.f32 %v2438_v27, %v854_v43  ;;  %1196 = vmatpush.msrb.mxu0 %v1103_v3  ;;  %1134 = vmatpush.msra.mxu2 %v1069_v34  ;;  %v1279_v3 = vld [vmem:[#allocation15 + $0x68] sm:$0xff]  ;;  %v1310_v34 = vld [vmem:[#allocation15 + $0x160] sm:$0xff] }
 0x195   :  { %v868_v25 = vld [vmem:[#allocation3 + $0x1c] sm:$0xff]  ;;  %1166 = vmatpush.msra.mxu3 %v1085_v16  ;;  %1320 = vmatpush.msrb.mxu1 %v1279_v3  ;;  %v1277_v16 = vld [vmem:[#allocation15 + $0x58] sm:$0xff] }
 0x196   :  { %v873_v45 = vld [vmem:[#allocation3 + $0x1e] sm:$0xff]  ;;  %864 = vst [vmem:[#allocation3 + $0x28] sm:$0xff] %v2482_v44  ;;  %957 = vmatmul.f32.gmra.mxu3 %v868_v25  ;;  %1024 = vmatmul.f32.gmra.mxu1 %v2482_v44 }
 0x197   :  { %989 = vmatmul.f32.gmra.mxu0 %v873_v45  ;;  %1135 = vmatpush.msra.mxu2 %v1068_v19  ;;  %v1267_v3 = vld [vmem:[#allocation15 + $0x8] sm:$0xff] }
 0x198   :  { %1197 = vmatpush.msrb.mxu0 %v1102_v6  ;;  %1167 = vmatpush.msra.mxu3 %v1084_v20  ;;  %v1276_v20 = vld [vmem:[#allocation15 + $0x50] sm:$0xff] }
 0x199   :  { %1350 = vmatpush.msrb.mxu2 %v1297_v57  ;;  %v1272_v57 = vld [vmem:[#allocation15 + $0x30] sm:$0xff] }
 0x19a   :  { %1198 = vmatpush.msrb.mxu0 %v1101_v1  ;;  %1382 = vmatpush.msrb.mxu3 %v1313_v59  ;;  %v1306_v59 = vld [vmem:[#allocation15 + $0x140] sm:$0xff] }
 0x19b   :  { %1351 = vmatpush.msrb.mxu2 %v1296_v62  ;;  %v1269_v62 = vld [vmem:[#allocation15 + $0x18] sm:$0xff] }
 0x19c   :  { %1199 = vmatpush.msrb.mxu0 %v1100_v9  ;;  %1383 = vmatpush.msrb.mxu3 %v1312_v63  ;;  %v1278_v9 = vld [vmem:[#allocation15 + $0x60] sm:$0xff]  ;;  %v1268_v63 = vld [vmem:[#allocation15 + $0x10] sm:$0xff] }
 0x19d   :  { %v869_v47 = vld [vmem:[#allocation3 + $0x24] sm:$0xff]  ;;  %1352 = vmatpush.msrb.mxu2 %v1295_v30  ;;  %1321 = vmatpush.msrb.mxu1 %v1278_v9  ;;  %v1299_v9 = vld [vmem:[#allocation15 + $0x108] sm:$0xff] }
 0x19e   :  { %v874_v49 = vld [vmem:[#allocation3 + $0x26] sm:$0xff]  ;;  %960 = vmatmul.f32.gmra.mxu3 %v869_v47 }
 0x19f   :  { %992 = vmatmul.f32.gmra.mxu0 %v874_v49  ;;  %1384 = vmatpush.msrb.mxu3 %v1311_v4  ;;  %v1304_v30 = vld [vmem:[#allocation15 + $0x130] sm:$0xff]  ;;  %v1290_v4 = vld [vmem:[#allocation15 + $0xc0] sm:$0xff] }
 0x1a0   :  { %1353 = vmatpush.msrb.mxu2 %v1294_v24  ;;  %1322 = vmatpush.msrb.mxu1 %v1277_v16  ;;  %v1289_v24 = vld [vmem:[#allocation15 + $0xb8] sm:$0xff] }
 0x1a1   :  { %1385 = vmatpush.msrb.mxu3 %v1310_v34  ;;  %v1283_v34 = vld [vmem:[#allocation15 + $0x88] sm:$0xff]  ;;  %v1637_v16 = vld [vmem:[#allocation18 + $0x78] sm:$0xff] }
 0x1a2   :  { %1354 = vmatpush.msrb.mxu2 %v1293_v11  ;;  %1323 = vmatpush.msrb.mxu1 %v1276_v20  ;;  %v1286_v11 = vld [vmem:[#allocation15 + $0xa0] sm:$0xff] }
 0x1f3   :  { %v1013_v23 = vpop.f32.mrf.mxu1 }
 0x1fb   :  { %v1016_v33 = vpop.f32.mrf.mxu1 }
 0x1fc   :  { %v981_v22 = vpop.f32.mrf.mxu0 }
 0x201   :  { %v949_v53 = vpop.f32.mrf.mxu3 }
 0x202   :  { %v950_v54 = vadd.f32 %v2489_v26, %v949_v53 }
 0x203   :  { %v1019_v49 = vpop.f32.mrf.mxu1 }
 0x204   :  { %v982_v28 = vadd.f32 %v981_v22, %v950_v54  ;;  %v984_v29 = vpop.f32.mrf.mxu0 }
 0x206   :  { %v1014_v31 = vadd.f32 %v1013_v23, %v982_v28 }
 0x208   :  { %vm1028_vm8 = vcmp.ge.f32.partialorder %v1014_v31, 0.0  ;;  %v1033_v37 = vmul.f32 0.01, %v1014_v31 }
 0x209   :  { %v952_v40 = vpop.f32.mrf.mxu3 }
 0x20a   :  { %v1038_v41 = vsel %vm1028_vm8, %v1014_v31, %v1033_v37  ;;  %v953_v48 = vadd.f32 %v2489_v26, %v952_v40 }
 0x20b   :  { %v1043_v42 = vmul.f32 %v2395_v39, %v1038_v41  ;;  %v1022_v8 = vpop.f32.mrf.mxu1 }
 0x20c   :  { %v985_v43 = vadd.f32 %v984_v29, %v953_v48  ;;  %v987_v45 = vpop.f32.mrf.mxu0 }
 0x20d   :  { %1048 = vst [vmem:[#allocation2 + $0x8] sm:$0xff] %v1043_v42  ;;  %1200 = vmatmul.f32.vlgmr.msrb.gmra.mxu0 %v1043_v42 }
 0x20e   :  { %v1017_v25 = vadd.f32 %v1016_v33, %v985_v43 }
 0x210   :  { %vm1029_vm9 = vcmp.ge.f32.partialorder %v1017_v25, 0.0  ;;  %v1034_v47 = vmul.f32 0.01, %v1017_v25 }
 0x211   :  { %v955_v17 = vpop.f32.mrf.mxu3 }
 0x212   :  { %v1039_v21 = vsel %vm1029_vm9, %v1017_v25, %v1034_v47  ;;  %v956_v18 = vadd.f32 %v2489_v26, %v955_v17  ;;  %v1275_v17 = vld [vmem:[#allocation15 + $0x48] sm:$0xff] }
 0x213   :  { %v1044_v52 = vmul.f32 %v2405_v10, %v1039_v21  ;;  %v1025_v40 = vpop.f32.mrf.mxu1  ;;  %v1292_v21 = vld [vmem:[#allocation15 + $0xd0] sm:$0xff]  ;;  %1324 = vmatpush.msrb.mxu1 %v1275_v17 }
 0x214   :  { %v988_v55 = vadd.f32 %v987_v45, %v956_v18  ;;  %v1053_v56 = vld [vmem:[#allocation2 + $0x4] sm:$0xff]  ;;  %v990_v5 = vpop.f32.mrf.mxu0  ;;  %1355 = vmatpush.msrb.mxu2 %v1292_v21  ;;  %v1628_v17 = vld [vmem:[#allocation18 + $0x30] sm:$0xff] }
 0x215   :  { %v1058_v46 = vld [vmem:[#allocation2 + $0x6] sm:$0xff]  ;;  %1049 = vst [vmem:[#allocation2 + $0x10] sm:$0xff] %v1044_v52  ;;  %1136 = vmatmul.f32.vlgmr.msra.gmra.mxu2 %v1053_v56  ;;  %1203 = vmatmul.f32.gmra.mxu0 %v1044_v52  ;;  %v1273_v56 = vld [vmem:[#allocation15 + $0x38] sm:$0xff] }
 0x216   :  { %1168 = vmatmul.f32.vlgmr.msra.gmra.mxu3 %v1058_v46  ;;  %v1020_v60 = vadd.f32 %v1019_v49, %v988_v55  ;;  %v1309_v49 = vld [vmem:[#allocation15 + $0x158] sm:$0xff]  ;;  %v1274_v18 = vld [vmem:[#allocation15 + $0x40] sm:$0xff]  ;;  %v1291_v52 = vld [vmem:[#allocation15 + $0xc8] sm:$0xff] }
 0x217   :  { %1386 = vmatpush.msrb.mxu3 %v1309_v49  ;;  %v1308_v55 = vld [vmem:[#allocation15 + $0x150] sm:$0xff]  ;;  %v1307_v46 = vld [vmem:[#allocation15 + $0x148] sm:$0xff]  ;;  %1325 = vmatpush.msrb.mxu1 %v1274_v18 }
 0x218   :  { %vm1030_vm10 = vcmp.ge.f32.partialorder %v1020_v60, 0.0  ;;  %v1035_v2 = vmul.f32 0.01, %v1020_v60  ;;  %1356 = vmatpush.msrb.mxu2 %v1291_v52  ;;  %v1627_v52 = vld [vmem:[#allocation18 + $0x28] sm:$0xff] }
 0x219   :  { %v958_v6 = vpop.f32.mrf.mxu3  ;;  %1387 = vmatpush.msrb.mxu3 %v1308_v55  ;;  %1326 = vmatpush.msrb.mxu1 %v1273_v56 }
 0x21a   :  { %v1040_v38 = vsel %vm1030_vm10, %v1020_v60, %v1035_v2  ;;  %v959_v1 = vadd.f32 %v2489_v26, %v958_v6  ;;  %v1270_v60 = vld [vmem:[#allocation15 + $0x20] sm:$0xff]  ;;  %v1303_v2 = vld [vmem:[#allocation15 + $0x128] sm:$0xff]  ;;  %1357 = vmatpush.msrb.mxu2 %v1290_v4 }
 0x21b   :  { %v1045_v50 = vmul.f32 %v2422_v35, %v1040_v38  ;;  %1388 = vmatpush.msrb.mxu3 %v1307_v46  ;;  %1327 = vmatpush.msrb.mxu1 %v1272_v57  ;;  %v1266_v6 = vld [vmem:[#allocation15] sm:$0xff]  ;;  %v1301_v38 = vld [vmem:[#allocation15 + $0x118] sm:$0xff] }
 0x21c   :  { %v991_v12 = vadd.f32 %v990_v5, %v959_v1  ;;  %v1054_v14 = vld [vmem:[#allocation2 + $0xc] sm:$0xff]  ;;  %v993_v29 = vpop.f32.mrf.mxu0  ;;  %v1302_v5 = vld [vmem:[#allocation15 + $0x120] sm:$0xff]  ;;  %1358 = vmatpush.msrb.mxu2 %v1289_v24 }
 0x21d   :  { %v1059_v15 = vld [vmem:[#allocation2 + $0xe] sm:$0xff]  ;;  %1050 = vst [vmem:[#allocation2 + $0x18] sm:$0xff] %v1045_v50  ;;  %1139 = vmatmul.f32.gmra.mxu2 %v1054_v14  ;;  %1206 = vmatmul.f32.gmra.mxu0 %v1045_v50  ;;  %v1285_v14 = vld [vmem:[#allocation15 + $0x98] sm:$0xff]  ;;  %v1626_v46 = vld [vmem:[#allocation18 + $0x20] sm:$0xff] }
 0x21e   :  { %1171 = vmatmul.f32.gmra.mxu3 %v1059_v15  ;;  %v1023_v19 = vadd.f32 %v1022_v8, %v991_v12  ;;  %1328 = vmatpush.msrb.mxu1 %v1271_v58  ;;  %v1288_v1 = vld [vmem:[#allocation15 + $0xb0] sm:$0xff]  ;;  %v1287_v8 = vld [vmem:[#allocation15 + $0xa8] sm:$0xff]  ;;  %v1298_v12 = vld [vmem:[#allocation15 + $0x100] sm:$0xff] }
 0x21f   :  { %1389 = vmatpush.msrb.mxu3 %v1306_v59  ;;  %v1300_v50 = vld [vmem:[#allocation15 + $0x110] sm:$0xff]  ;;  %1359 = vmatpush.msrb.mxu2 %v1288_v1  ;;  %v1622_v24 = vld [vmem:[#allocation18] sm:$0xff] }
 0x220   :  { %vm1031_vm11 = vcmp.ge.f32.partialorder %v1023_v19, 0.0  ;;  %v1036_v22 = vmul.f32 0.01, %v1023_v19  ;;  %1329 = vmatpush.msrb.mxu1 %v1270_v60  ;;  %v1284_v15 = vld [vmem:[#allocation15 + $0x90] sm:$0xff] }
 0x221   :  { %v961_v23 = vpop.f32.mrf.mxu3  ;;  %1390 = vmatpush.msrb.mxu3 %v1305_v61  ;;  %1360 = vmatpush.msrb.mxu2 %v1287_v8 }
 0x222   :  { %v1041_v53 = vsel %vm1031_vm11, %v1023_v19, %v1036_v22  ;;  %v962_v54 = vadd.f32 %v2489_v26, %v961_v23  ;;  %1330 = vmatpush.msrb.mxu1 %v1269_v62  ;;  %v1636_v19 = vld [vmem:[#allocation18 + $0x70] sm:$0xff]  ;;  %v1635_v22 = vld [vmem:[#allocation18 + $0x68] sm:$0xff]  ;;  %v2505_v23 = vld [vmem:[%s2583_s10] ss:$0 sm:$0xff] }
 0x223   :  { %v1046_v28 = vmul.f32 %v2431_v13, %v1041_v53  ;;  %1391 = vmatpush.msrb.mxu3 %v1304_v30  ;;  %1361 = vmatpush.msrb.mxu2 %v1286_v11  ;;  %v1634_v53 = vld [vmem:[#allocation18 + $0x60] sm:$0xff]  ;;  %v1624_v30 = vld [vmem:[#allocation18 + $0x10] sm:$0xff] }
 0x224   :  { %v994_v31 = vadd.f32 %v993_v29, %v962_v54  ;;  %v1055_v33 = vld [vmem:[#allocation2 + $0x14] sm:$0xff]  ;;  %1331 = vmatpush.msrb.mxu1 %v1268_v63 }
 0x225   :  { %v1060_v37 = vld [vmem:[#allocation2 + $0x16] sm:$0xff]  ;;  %1051 = vst [vmem:[#allocation2 + $0x20] sm:$0xff] %v1046_v28  ;;  %1142 = vmatmul.f32.gmra.mxu2 %v1055_v33  ;;  %1209 = vmatmul.f32.gmra.mxu0 %v1046_v28 }
 0x226   :  { %1174 = vmatmul.f32.gmra.mxu3 %v1060_v37  ;;  %v1026_v41 = vadd.f32 %v1025_v40, %v994_v31  ;;  %1332 = vmatpush.msrb.mxu1 %v1267_v3  ;;  %v1633_v54 = vld [vmem:[#allocation18 + $0x58] sm:$0xff]  ;;  %v1632_v33 = vld [vmem:[#allocation18 + $0x50] sm:$0xff]  ;;  %v1631_v40 = vld [vmem:[#allocation18 + $0x48] sm:$0xff] }
 0x227   :  { %1392 = vmatpush.msrb.mxu3 %v1303_v2  ;;  %1362 = vmatpush.msrb.mxu2 %v1285_v14  ;;  %v1623_v3 = vld [vmem:[#allocation18 + $0x8] sm:$0xff] }
 0x228   :  { %vm1032_vm12 = vcmp.ge.f32.partialorder %v1026_v41, 0.0  ;;  %v1037_v48 = vmul.f32 0.01, %v1026_v41  ;;  %1333 = vmatpush.msrb.mxu1 %v1266_v6 }
 0x229   :  { %1393 = vmatpush.msrb.mxu3 %v1302_v5  ;;  %1334 = vmatmul.f32.vlgmr.msrb.gmra.mxu1 %v2435_v0  ;;  %v1282_v0 = vld [vmem:[#allocation15 + $0x80] sm:$0xff] }
 0x22a   :  { %v1042_v42 = vsel %vm1032_vm12, %v1026_v41, %v1037_v48  ;;  %1363 = vmatpush.msrb.mxu2 %v1284_v15  ;;  %vm1707_vm12 = vcmask 1040384  }
 0x22b   :  { %v1047_v43 = vmul.f32 %v2438_v27, %v1042_v42  ;;  %1394 = vmatpush.msrb.mxu3 %v1301_v38  ;;  %v1630_v42 = vld [vmem:[#allocation18 + $0x40] sm:$0xff] }
 0x22c   :  { %v1056_v25 = vld [vmem:[#allocation2 + $0x1c] sm:$0xff]  ;;  %1364 = vmatpush.msrb.mxu2 %v1283_v34 }
 0x22d   :  { %v1061_v26 = vld [vmem:[#allocation2 + $0x1e] sm:$0xff]  ;;  %1052 = vst [vmem:[#allocation2 + $0x28] sm:$0xff] %v1047_v43  ;;  %1145 = vmatmul.f32.gmra.mxu2 %v1056_v25  ;;  %1212 = vmatmul.f32.gmra.mxu0 %v1047_v43 }
 0x22e   :  { %1177 = vmatmul.f32.gmra.mxu3 %v1061_v26  ;;  %1365 = vmatpush.msrb.mxu2 %v1282_v0  ;;  %v1629_v25 = vld [vmem:[#allocation18 + $0x38] sm:$0xff] }
 0x22f   :  { %1395 = vmatpush.msrb.mxu3 %v1300_v50 }
 0x231   :  { %1396 = vmatpush.msrb.mxu3 %v1299_v9 }
 0x233   :  { %1397 = vmatpush.msrb.mxu3 %v1298_v12 }
 0x234   :  { %v1057_v45 = vld [vmem:[#allocation2 + $0x24] sm:$0xff] }
 0x235   :  { %v1062_v47 = vld [vmem:[#allocation2 + $0x26] sm:$0xff]  ;;  %1148 = vmatmul.f32.gmra.mxu2 %v1057_v45  ;;  %1642 = vmatpush.msra.mxu3 %v1637_v16 }
 0x236   :  { %1180 = vmatmul.f32.gmra.mxu3 %v1062_v47 }
 0x237   :  { %1643 = vmatpush.msra.mxu3 %v1636_v19 }
 0x239   :  { %1644 = vmatpush.msra.mxu3 %v1635_v22 }
 0x23b   :  { %1645 = vmatpush.msra.mxu3 %v1634_v53 }
 0x23d   :  { %1646 = vmatpush.msra.mxu3 %v1633_v54 }
 0x23f   :  { %1647 = vmatpush.msra.mxu3 %v1632_v33 }
 0x241   :  { %1648 = vmatpush.msra.mxu3 %v1631_v40 }
 0x243   :  { %1649 = vmatpush.msra.mxu3 %v1630_v42  ;;  %v1469_v42 = vld [vmem:[#allocation16 + $0x78] sm:$0xff] }
 0x244   :  { %1506 = vmatpush.msra.mxu0 %v1469_v42 }
 0x245   :  { %1650 = vmatpush.msra.mxu3 %v1629_v25  ;;  %v1500_v25 = vld [vmem:[#allocation16 + $0x170] sm:$0xff] }
 0x247   :  { %1651 = vmatpush.msra.mxu3 %v1628_v17  ;;  %v1498_v17 = vld [vmem:[#allocation16 + $0x160] sm:$0xff] }
 0x249   :  { %1652 = vmatpush.msra.mxu3 %v1627_v52  ;;  %v1497_v52 = vld [vmem:[#allocation16 + $0x158] sm:$0xff] }
 0x24b   :  { %1653 = vmatpush.msra.mxu3 %v1626_v46  ;;  %v1496_v46 = vld [vmem:[#allocation16 + $0x150] sm:$0xff] }
 0x28a   :  { %v1201_v20 = vpop.f32.mrf.mxu0 }
 0x292   :  { %v1204_v48 = vpop.f32.mrf.mxu0 }
 0x298   :  { %v1137_v28 = vpop.f32.mrf.mxu2 }
 0x299   :  { %v1169_v29 = vpop.f32.mrf.mxu3  ;;  %v1138_v31 = vadd.f32 %v2505_v23, %v1137_v28 }
 0x29a   :  { %v1207_v58 = vpop.f32.mrf.mxu0 }
 0x29b   :  { %v1170_v37 = vadd.f32 %v1169_v29, %v1138_v31 }
 0x29d   :  { %v1202_v41 = vadd.f32 %v1201_v20, %v1170_v37 }
 0x29f   :  { %vm1216_vm13 = vcmp.ge.f32.partialorder %v1202_v41, 0.0  ;;  %v1221_v43 = vmul.f32 0.01, %v1202_v41 }
 0x2a0   :  { %v1140_v26 = vpop.f32.mrf.mxu2 }
 0x2a1   :  { %v1172_v45 = vpop.f32.mrf.mxu3  ;;  %v1226_v47 = vsel %vm1216_vm13, %v1202_v41, %v1221_v43  ;;  %v1141_v49 = vadd.f32 %v2505_v23, %v1140_v26  ;;  %v1468_v43 = vld [vmem:[#allocation16 + $0x70] sm:$0xff]  ;;  %v1485_v26 = vld [vmem:[#allocation16 + $0xf8] sm:$0xff] }
 0x2a2   :  { %v1236_v21 = vadd.f32 %v1226_v47, %v2455_v36  ;;  %v1625_v36 = vld [vmem:[#allocation18 + $0x18] sm:$0xff]  ;;  %v1210_v11 = vpop.f32.mrf.mxu0  ;;  %1538 = vmatpush.msra.mxu1 %v1485_v26  ;;  %v1484_v47 = vld [vmem:[#allocation16 + $0xf0] sm:$0xff]  ;;  %1507 = vmatpush.msra.mxu0 %v1468_v43 }
 0x2a3   :  { %v1173_v18 = vadd.f32 %v1172_v45, %v1141_v49  ;;  %1654 = vmatpush.msra.mxu3 %v1625_v36  ;;  %v1467_v45 = vld [vmem:[#allocation16 + $0x68] sm:$0xff]  ;;  %v1466_v49 = vld [vmem:[#allocation16 + $0x60] sm:$0xff] }
 0x2a4   :  { %v2511_v55 = vmul.f32 %v2395_v39, %v1236_v21  ;;  %1539 = vmatpush.msra.mxu1 %v1484_v47  ;;  %1508 = vmatpush.msra.mxu0 %v1467_v45  ;;  %v1465_v21 = vld [vmem:[#allocation16 + $0x58] sm:$0xff]  ;;  %v1495_v36 = vld [vmem:[#allocation16 + $0x148] sm:$0xff] }
 0x2a5   :  { %v1205_v56 = vadd.f32 %v1204_v48, %v1173_v18  ;;  %1655 = vmatpush.msra.mxu3 %v1624_v30  ;;  %v1501_v48 = vld [vmem:[#allocation16 + $0x178] sm:$0xff]  ;;  %v1483_v18 = vld [vmem:[#allocation16 + $0xe8] sm:$0xff]  ;;  %v1460_v30 = vld [vmem:[#allocation16 + $0x30] sm:$0xff] }
 0x2a6   :  { %1246 = vst [vmem:[#allocation2 + $0x8] sm:$0xff] %v2511_v55  ;;  %1337 = vmatmul.f32.gmra.mxu1 %v2511_v55  ;;  %1398 = vmatmul.f32.vlgmr.msrb.gmra.mxu3 %v2511_v55 }
 0x2a7   :  { %vm1217_vm14 = vcmp.ge.f32.partialorder %v1205_v56, 0.0  ;;  %v1222_v57 = vmul.f32 0.01, %v1205_v56  ;;  %1656 = vmatpush.msra.mxu3 %v1623_v3  ;;  %1570 = vmatpush.msra.mxu2 %v1501_v48  ;;  %v1459_v3 = vld [vmem:[#allocation16 + $0x28] sm:$0xff] }
 0x2a8   :  { %v1143_v59 = vpop.f32.mrf.mxu2  ;;  %1509 = vmatpush.msra.mxu0 %v1466_v49  ;;  %1540 = vmatpush.msra.mxu1 %v1483_v18 }
 0x2a9   :  { %v1175_v60 = vpop.f32.mrf.mxu3  ;;  %v1227_v61 = vsel %vm1217_vm14, %v1205_v56, %v1222_v57  ;;  %v1144_v62 = vadd.f32 %v2505_v23, %v1143_v59  ;;  %1657 = vmatpush.msra.mxu3 %v1622_v24  ;;  %1571 = vmatpush.msra.mxu2 %v1500_v25  ;;  %v1482_v56 = vld [vmem:[#allocation16 + $0xe0] sm:$0xff]  ;;  %v1463_v57 = vld [vmem:[#allocation16 + $0x48] sm:$0xff]  ;;  %v1456_v24 = vld [vmem:[#allocation16 + $0x10] sm:$0xff] }
 0x2aa   :  { %v1237_v63 = vadd.f32 %v1227_v61, %v2462_v51  ;;  %v1213_v28 = vpop.f32.mrf.mxu0  ;;  %1510 = vmatpush.msra.mxu0 %v1465_v21  ;;  %1541 = vmatpush.msra.mxu1 %v1482_v56  ;;  %v1462_v59 = vld [vmem:[#allocation16 + $0x40] sm:$0xff]  ;;  %v1480_v61 = vld [vmem:[#allocation16 + $0xd0] sm:$0xff] }
 0x2ab   :  { %v1176_v2 = vadd.f32 %v1175_v60, %v1144_v62  ;;  %v1461_v60 = vld [vmem:[#allocation16 + $0x38] sm:$0xff]  ;;  %v1494_v62 = vld [vmem:[#allocation16 + $0x140] sm:$0xff] }
 0x2ac   :  { %v2519_v4 = vmul.f32 %v2405_v10, %v1237_v63  ;;  %v1479_v63 = vld [vmem:[#allocation16 + $0xc8] sm:$0xff] }
 0x2ad   :  { %v1208_v5 = vadd.f32 %v1207_v58, %v1176_v2  ;;  %v1256_v6 = vld [vmem:[#allocation2 + $0x4] sm:$0xff]  ;;  %v1481_v58 = vld [vmem:[#allocation16 + $0xd8] sm:$0xff] }
 0x2ae   :  { %1247 = vst [vmem:[#allocation2 + $0x10] sm:$0xff] %v2519_v4  ;;  %1366 = vmatmul.f32.vlgmr.msrb.gmra.mxu2 %v1256_v6  ;;  %1340 = vmatmul.f32.gmra.mxu1 %v2519_v4  ;;  %v1493_v2 = vld [vmem:[#allocation16 + $0x138] sm:$0xff]  ;;  %v1492_v6 = vld [vmem:[#allocation16 + $0x130] sm:$0xff] }
 0x2af   :  { %vm1218_vm15 = vcmp.ge.f32.partialorder %v1208_v5, 0.0  ;;  %v1223_v38 = vmul.f32 0.01, %v1208_v5  ;;  %1401 = vmatmul.f32.gmra.mxu3 %v2519_v4  ;;  %1542 = vmatpush.msra.mxu1 %v1481_v58 }
 0x2b0   :  { %v1146_v51 = vpop.f32.mrf.mxu2 }
 0x2b1   :  { %v1178_v1 = vpop.f32.mrf.mxu3  ;;  %v1228_v50 = vsel %vm1218_vm15, %v1208_v5, %v1223_v38  ;;  %v1147_v8 = vadd.f32 %v2505_v23, %v1146_v51  ;;  %1543 = vmatpush.msra.mxu1 %v1480_v61  ;;  %v1457_v5 = vld [vmem:[#allocation16 + $0x18] sm:$0xff]  ;;  %v1491_v38 = vld [vmem:[#allocation16 + $0x128] sm:$0xff] }
 0x2b2   :  { %v1238_v9 = vadd.f32 %v1228_v50, %v2469_v7  ;;  %v1455_v51 = vld [vmem:[#allocation16 + $0x8] sm:$0xff]  ;;  %v1490_v50 = vld [vmem:[#allocation16 + $0x120] sm:$0xff] }
 0x2b3   :  { %v1179_v12 = vadd.f32 %v1178_v1, %v1147_v8  ;;  %1544 = vmatpush.msra.mxu1 %v1479_v63  ;;  %v1478_v1 = vld [vmem:[#allocation16 + $0xc0] sm:$0xff] }
 0x2b4   :  { %v1243_v14 = vmul.f32 %v2422_v35, %v1238_v9  ;;  %v1454_v8 = vld [vmem:[#allocation16] sm:$0xff]  ;;  %v1477_v9 = vld [vmem:[#allocation16 + $0xb8] sm:$0xff] }
 0x2b5   :  { %v1211_v15 = vadd.f32 %v1210_v11, %v1179_v12  ;;  %v1257_v34 = vld [vmem:[#allocation2 + $0xc] sm:$0xff]  ;;  %1545 = vmatpush.msra.mxu1 %v1478_v1  ;;  %v1489_v11 = vld [vmem:[#allocation16 + $0x118] sm:$0xff] }
 0x2b6   :  { %1248 = vst [vmem:[#allocation2 + $0x18] sm:$0xff] %v1243_v14  ;;  %1369 = vmatmul.f32.gmra.mxu2 %v1257_v34  ;;  %1343 = vmatmul.f32.gmra.mxu1 %v1243_v14  ;;  %v1476_v12 = vld [vmem:[#allocation16 + $0xb0] sm:$0xff]  ;;  %v1475_v34 = vld [vmem:[#allocation16 + $0xa8] sm:$0xff] }
 0x2b7   :  { %vm1219_vm0 = vcmp.ge.f32.partialorder %v1211_v15, 0.0  ;;  %v1224_v0 = vmul.f32 0.01, %v1211_v15  ;;  %1404 = vmatmul.f32.gmra.mxu3 %v1243_v14  ;;  %1546 = vmatpush.msra.mxu1 %v1477_v9 }
 0x2b8   :  { %v1149_v16 = vpop.f32.mrf.mxu2 }
 0x2b9   :  { %v1229_v19 = vsel %vm1219_vm0, %v1211_v15, %v1224_v0  ;;  %v1150_v20 = vadd.f32 %v2505_v23, %v1149_v16  ;;  %v1181_v53 = vpop.f32.mrf.mxu3  ;;  %v1488_v15 = vld [vmem:[#allocation16 + $0x110] sm:$0xff]  ;;  %1547 = vmatpush.msra.mxu1 %v1476_v12  ;;  %v1487_v0 = vld [vmem:[#allocation16 + $0x108] sm:$0xff]  ;;  %v1474_v16 = vld [vmem:[#allocation16 + $0xa0] sm:$0xff] }
 0x2ba   :  { %v1239_v22 = vadd.f32 %v1229_v19, %v2476_v32  ;;  %v1486_v19 = vld [vmem:[#allocation16 + $0x100] sm:$0xff] }
 0x2bb   :  { %v1182_v7 = vadd.f32 %v1181_v53, %v1150_v20  ;;  %1548 = vmatpush.msra.mxu1 %v1475_v34  ;;  %v1473_v20 = vld [vmem:[#allocation16 + $0x98] sm:$0xff]  ;;  %v1471_v53 = vld [vmem:[#allocation16 + $0x88] sm:$0xff] }
 0x2bc   :  { %v1244_v54 = vmul.f32 %v2431_v13, %v1239_v22  ;;  %v1472_v22 = vld [vmem:[#allocation16 + $0x90] sm:$0xff] }
 0x2bd   :  { %v1214_v29 = vadd.f32 %v1213_v28, %v1182_v7  ;;  %v1258_v31 = vld [vmem:[#allocation2 + $0x14] sm:$0xff]  ;;  %1549 = vmatpush.msra.mxu1 %v1474_v16  ;;  %v1470_v7 = vld [vmem:[#allocation16 + $0x80] sm:$0xff] }
 0x2be   :  { %1249 = vst [vmem:[#allocation2 + $0x20] sm:$0xff] %v1244_v54  ;;  %1372 = vmatmul.f32.gmra.mxu2 %v1258_v31  ;;  %1346 = vmatmul.f32.gmra.mxu1 %v1244_v54  ;;  %v2545_v16 = vld [vmem:[%s2587_s14] ss:$0 sm:$0xff] }
 0x2bf   :  { %vm1220_vm1 = vcmp.ge.f32.partialorder %v1214_v29, 0.0  ;;  %v1225_v33 = vmul.f32 0.01, %v1214_v29  ;;  %1407 = vmatmul.f32.gmra.mxu3 %v1244_v54  ;;  %1550 = vmatpush.msra.mxu1 %v1473_v20 }
 0x2c1   :  { %v1230_v37 = vsel %vm1220_vm1, %v1214_v29, %v1225_v33  ;;  %1551 = vmatpush.msra.mxu1 %v1472_v22  ;;  %v1797_v29 = vld [vmem:[%s2585_s12] ss:$0 sm:$0xff] }
 0x2c2   :  { %v1240_v40 = vadd.f32 %v1230_v37, %v2482_v44  ;;  %v1499_v44 = vld [vmem:[#allocation16 + $0x168] sm:$0xff] }
 0x2c3   :  { %1572 = vmatpush.msra.mxu2 %v1499_v44  ;;  %1552 = vmatpush.msra.mxu1 %v1471_v53 }
 0x2c4   :  { %v1245_v23 = vmul.f32 %v2438_v27, %v1240_v40 }
 0x2c5   :  { %v1259_v41 = vld [vmem:[#allocation2 + $0x1c] sm:$0xff]  ;;  %1573 = vmatpush.msra.mxu2 %v1498_v17  ;;  %1553 = vmatpush.msra.mxu1 %v1470_v7  ;;  %v1723_v7 = vld [vmem:[#allocation19 + $0x70] sm:$0xff] }
 0x2c6   :  { %1250 = vst [vmem:[#allocation2 + $0x28] sm:$0xff] %v1245_v23  ;;  %1375 = vmatmul.f32.gmra.mxu2 %v1259_v41 }
 0x2c7   :  { %1410 = vmatmul.f32.gmra.mxu3 %v1245_v23  ;;  %1574 = vmatpush.msra.mxu2 %v1497_v52 }
 0x2c9   :  { %1575 = vmatpush.msra.mxu2 %v1496_v46 }
 0x2cb   :  { %1576 = vmatpush.msra.mxu2 %v1495_v36 }
 0x2cd   :  { %v1260_v32 = vld [vmem:[#allocation2 + $0x24] sm:$0xff]  ;;  %1577 = vmatpush.msra.mxu2 %v1494_v62 }
 0x2ce   :  { %1378 = vmatmul.f32.gmra.mxu2 %v1260_v32 }
 0x2cf   :  { %1658 = vmatmul.f32.vlgmr.msra.gmra.mxu3 %v2511_v55  ;;  %v1464_v55 = vld [vmem:[#allocation16 + $0x50] sm:$0xff]  ;;  %1578 = vmatpush.msra.mxu2 %v1493_v2 }
 0x2d0   :  { %1511 = vmatpush.msra.mxu0 %v1464_v55 }
 0x2d1   :  { %1579 = vmatpush.msra.mxu2 %v1492_v6 }
 0x2d2   :  { %1512 = vmatpush.msra.mxu0 %v1463_v57 }
 0x2d3   :  { %1580 = vmatpush.msra.mxu2 %v1491_v38 }
 0x2d4   :  { %1513 = vmatpush.msra.mxu0 %v1462_v59 }
 0x2d5   :  { %1581 = vmatpush.msra.mxu2 %v1490_v50 }
 0x2d6   :  { %1514 = vmatpush.msra.mxu0 %v1461_v60 }
 0x2d7   :  { %1661 = vmatmul.f32.gmra.mxu3 %v2519_v4  ;;  %v1458_v4 = vld [vmem:[#allocation16 + $0x20] sm:$0xff]  ;;  %1582 = vmatpush.msra.mxu2 %v1489_v11 }
 0x2d8   :  { %1515 = vmatpush.msra.mxu0 %v1460_v30 }
 0x2d9   :  { %1583 = vmatpush.msra.mxu2 %v1488_v15 }
 0x2da   :  { %1516 = vmatpush.msra.mxu0 %v1459_v3 }
 0x2db   :  { %1584 = vmatpush.msra.mxu2 %v1487_v0 }
 0x2dc   :  { %1517 = vmatpush.msra.mxu0 %v1458_v4 }
 0x2dd   :  { %1585 = vmatpush.msra.mxu2 %v1486_v19  ;;  %v1724_v19 = vld [vmem:[#allocation19 + $0x78] sm:$0xff] }
 0x2de   :  { %1518 = vmatpush.msra.mxu0 %v1457_v5 }
 0x2df   :  { %1664 = vmatmul.f32.gmra.mxu3 %v1243_v14  ;;  %v1802_v14 = vld [vmem:[#allocation2] sm:$0xff] }
 0x2e0   :  { %1519 = vmatpush.msra.mxu0 %v1456_v24 }
 0x2e2   :  { %1520 = vmatpush.msra.mxu0 %v1455_v51 }
 0x2e4   :  { %1521 = vmatpush.msra.mxu0 %v1454_v8 }
 0x2e5   :  { %1522 = vmatmul.f32.vlgmr.msra.gmra.mxu0 %v1802_v14 }
 0x2e6   :  { %1729 = vmatpush.msrb.mxu0 %v1724_v19 }
 0x2e7   :  { %1667 = vmatmul.f32.gmra.mxu3 %v1244_v54  ;;  %v1335_v54 = vpop.f32.mrf.mxu1 }
 0x2e8   :  { %v1336_v31 = vadd.f32 %v1797_v29, %v1335_v54  ;;  %1730 = vmatpush.msrb.mxu0 %v1723_v7 }
 0x2ef   :  { %1670 = vmatmul.f32.gmra.mxu3 %v1245_v23 }
 0x323   :  { %v1338_v33 = vpop.f32.mrf.mxu1 }
 0x324   :  { %v1339_v48 = vadd.f32 %v1797_v29, %v1338_v33  ;;  %v1721_v33 = vld [vmem:[#allocation19 + $0x60] sm:$0xff] }
 0x329   :  { %v1399_v28 = vpop.f32.mrf.mxu3 }
 0x32b   :  { %v1341_v25 = vpop.f32.mrf.mxu1 }
 0x32c   :  { %v1342_v17 = vadd.f32 %v1797_v29, %v1341_v25 }
 0x331   :  { %v1367_v37 = vpop.f32.mrf.mxu2 }
 0x332   :  { %v1368_v40 = vadd.f32 %v1367_v37, %v1336_v31  ;;  %v1402_v41 = vpop.f32.mrf.mxu3  ;;  %v2551_v31 = vld [vmem:[%s2589_s16] ss:$0 sm:$0xff] }
 0x333   :  { %v1344_v46 = vpop.f32.mrf.mxu1 }
 0x334   :  { %v1400_v23 = vadd.f32 %v1399_v28, %v1368_v40  ;;  %v1345_v36 = vadd.f32 %v1797_v29, %v1344_v46  ;;  %v1722_v28 = vld [vmem:[#allocation19 + $0x68] sm:$0xff]  ;;  %v1720_v40 = vld [vmem:[#allocation19 + $0x58] sm:$0xff] }
 0x335   :  { %1731 = vmatpush.msrb.mxu0 %v1722_v28 }
 0x336   :  { %vm1414_vm2 = vcmp.ge.f32.partialorder %v1400_v23, 0.0  ;;  %v1419_v32 = vmul.f32 0.01, %v1400_v23 }
 0x337   :  { %1732 = vmatpush.msrb.mxu0 %v1721_v33 }
 0x338   :  { %v1424_v42 = vsel %vm1414_vm2, %v1400_v23, %v1419_v32 }
 0x339   :  { %v1429_v43 = vmul.f32 %v2395_v39, %v1424_v42  ;;  %v1370_v26 = vpop.f32.mrf.mxu2  ;;  %1733 = vmatpush.msrb.mxu0 %v1720_v40 }
 0x33a   :  { %v1371_v45 = vadd.f32 %v1370_v26, %v1339_v48  ;;  %v1405_v49 = vpop.f32.mrf.mxu3  ;;  %v1719_v48 = vld [vmem:[#allocation19 + $0x50] sm:$0xff] }
 0x33b   :  { %1434 = vst [vmem:[#allocation3 + $0x8] sm:$0xff] %v1429_v43  ;;  %1525 = vmatmul.f32.gmra.mxu0 %v1429_v43  ;;  %1586 = vmatmul.f32.vlgmr.msra.gmra.mxu2 %v1429_v43  ;;  %v1347_v3 = vpop.f32.mrf.mxu1 }
 0x33c   :  { %v1403_v44 = vadd.f32 %v1402_v41, %v1371_v45  ;;  %v1348_v5 = vadd.f32 %v1797_v29, %v1347_v3  ;;  %1734 = vmatpush.msrb.mxu0 %v1719_v48  ;;  %v1712_v3 = vld [vmem:[#allocation19 + $0x18] sm:$0xff] }
 0x33e   :  { %vm1415_vm3 = vcmp.ge.f32.partialorder %v1403_v44, 0.0  ;;  %v1420_v47 = vmul.f32 0.01, %v1403_v44 }
 0x340   :  { %v1425_v21 = vsel %vm1415_vm3, %v1403_v44, %v1420_v47  ;;  %v1718_v47 = vld [vmem:[#allocation19 + $0x48] sm:$0xff] }
 0x341   :  { %v1430_v18 = vmul.f32 %v2405_v10, %v1425_v21  ;;  %v1373_v52 = vpop.f32.mrf.mxu2  ;;  %1735 = vmatpush.msrb.mxu0 %v1718_v47  ;;  %v1717_v21 = vld [vmem:[#allocation19 + $0x40] sm:$0xff] }
 0x342   :  { %v1374_v55 = vadd.f32 %v1373_v52, %v1342_v17  ;;  %v1444_v56 = vld [vmem:[#allocation3 + $0x4] sm:$0xff]  ;;  %v1408_v62 = vpop.f32.mrf.mxu3 }
 0x343   :  { %1435 = vst [vmem:[#allocation3 + $0x10] sm:$0xff] %v1430_v18  ;;  %1554 = vmatmul.f32.vlgmr.msra.gmra.mxu1 %v1444_v56  ;;  %1528 = vmatmul.f32.gmra.mxu0 %v1430_v18  ;;  %v1716_v52 = vld [vmem:[#allocation19 + $0x38] sm:$0xff] }
 0x344   :  { %v1406_v57 = vadd.f32 %v1405_v49, %v1374_v55  ;;  %1589 = vmatmul.f32.gmra.mxu2 %v1430_v18  ;;  %1736 = vmatpush.msrb.mxu0 %v1717_v21  ;;  %v1715_v55 = vld [vmem:[#allocation19 + $0x30] sm:$0xff] }
 0x346   :  { %vm1416_vm4 = vcmp.ge.f32.partialorder %v1406_v57, 0.0  ;;  %v1421_v58 = vmul.f32 0.01, %v1406_v57  ;;  %1737 = vmatpush.msrb.mxu0 %v1716_v52 }
 0x348   :  { %v1426_v59 = vsel %vm1416_vm4, %v1406_v57, %v1421_v58  ;;  %v1714_v57 = vld [vmem:[#allocation19 + $0x28] sm:$0xff]  ;;  %1738 = vmatpush.msrb.mxu0 %v1715_v55 }
 0x349   :  { %v1431_v60 = vmul.f32 %v2422_v35, %v1426_v59  ;;  %v1376_v61 = vpop.f32.mrf.mxu2 }
 0x34a   :  { %v1377_v30 = vadd.f32 %v1376_v61, %v1345_v36  ;;  %v1445_v63 = vld [vmem:[#allocation3 + $0xc] sm:$0xff]  ;;  %v1411_v50 = vpop.f32.mrf.mxu3  ;;  %1739 = vmatpush.msrb.mxu0 %v1714_v57 }
 0x34b   :  { %1436 = vst [vmem:[#allocation3 + $0x18] sm:$0xff] %v1431_v60  ;;  %1557 = vmatmul.f32.gmra.mxu1 %v1445_v63  ;;  %1531 = vmatmul.f32.gmra.mxu0 %v1431_v60 }
 0x34c   :  { %v1409_v2 = vadd.f32 %v1408_v62, %v1377_v30  ;;  %1592 = vmatmul.f32.gmra.mxu2 %v1431_v60  ;;  %v1713_v62 = vld [vmem:[#allocation19 + $0x20] sm:$0xff] }
 0x34d   :  { %1740 = vmatpush.msrb.mxu0 %v1713_v62 }
 0x34e   :  { %vm1417_vm5 = vcmp.ge.f32.partialorder %v1409_v2, 0.0  ;;  %v1422_v4 = vmul.f32 0.01, %v1409_v2 }
 0x34f   :  { %1741 = vmatpush.msrb.mxu0 %v1712_v3 }
 0x350   :  { %v1427_v6 = vsel %vm1417_vm5, %v1409_v2, %v1422_v4 }
 0x351   :  { %v1432_v24 = vmul.f32 %v2431_v13, %v1427_v6  ;;  %v1379_v38 = vpop.f32.mrf.mxu2 }
 0x352   :  { %v1380_v51 = vadd.f32 %v1379_v38, %v1348_v5  ;;  %v1446_v1 = vld [vmem:[#allocation3 + $0x14] sm:$0xff]  ;;  %v1659_v0 = vpop.f32.mrf.mxu3  ;;  %v1711_v5 = vld [vmem:[#allocation19 + $0x10] sm:$0xff] }
 0x353   :  { %1437 = vst [vmem:[#allocation3 + $0x20] sm:$0xff] %v1432_v24  ;;  %1560 = vmatmul.f32.gmra.mxu1 %v1446_v1  ;;  %1534 = vmatmul.f32.gmra.mxu0 %v1432_v24  ;;  %v1660_v32 = vadd.f32 %v2551_v31, %v1659_v0  ;;  %v1710_v38 = vld [vmem:[#allocation19 + $0x8] sm:$0xff] }
 0x354   :  { %v1412_v8 = vadd.f32 %v1411_v50, %v1380_v51  ;;  %1595 = vmatmul.f32.gmra.mxu2 %v1432_v24  ;;  %1742 = vmatpush.msrb.mxu0 %v1711_v5 }
 0x356   :  { %vm1418_vm6 = vcmp.ge.f32.partialorder %v1412_v8, 0.0  ;;  %v1423_v9 = vmul.f32 0.01, %v1412_v8  ;;  %1743 = vmatpush.msrb.mxu0 %v1710_v38 }
 0x358   :  { %v1428_v11 = vsel %vm1418_vm6, %v1412_v8, %v1423_v9 }
 0x359   :  { %v1433_v12 = vmul.f32 %v2438_v27, %v1428_v11 }
 0x35a   :  { %v1447_v14 = vld [vmem:[#allocation3 + $0x1c] sm:$0xff]  ;;  %v1662_v23 = vpop.f32.mrf.mxu3 }
 0x35b   :  { %1438 = vst [vmem:[#allocation3 + $0x28] sm:$0xff] %v1433_v12  ;;  %1563 = vmatmul.f32.gmra.mxu1 %v1447_v14  ;;  %v1663_v46 = vadd.f32 %v2551_v31, %v1662_v23 }
 0x35c   :  { %1598 = vmatmul.f32.gmra.mxu2 %v1433_v12 }
 0x362   :  { %v1448_v15 = vld [vmem:[#allocation3 + $0x24] sm:$0xff]  ;;  %v1523_v34 = vpop.f32.mrf.mxu0  ;;  %v1665_v58 = vpop.f32.mrf.mxu3 }
 0x363   :  { %1566 = vmatmul.f32.gmra.mxu1 %v1448_v15  ;;  %v1524_v20 = vadd.f32 %v2545_v16, %v1523_v34  ;;  %v1666_v24 = vadd.f32 %v2551_v31, %v1665_v58 }
 0x36a   :  { %v1668_v11 = vpop.f32.mrf.mxu3 }
 0x36b   :  { %v1669_v19 = vadd.f32 %v2551_v31, %v1668_v11 }
 0x3b8   :  { %v1526_v22 = vpop.f32.mrf.mxu0 }
 0x3b9   :  { %v1527_v42 = vadd.f32 %v2545_v16, %v1526_v22 }
 0x3be   :  { %v1587_v53 = vpop.f32.mrf.mxu2 }
 0x3c0   :  { %v1555_v54 = vpop.f32.mrf.mxu1  ;;  %v1529_v45 = vpop.f32.mrf.mxu0 }
 0x3c1   :  { %v1556_v29 = vadd.f32 %v1555_v54, %v1524_v20  ;;  %v1530_v36 = vadd.f32 %v2545_v16, %v1529_v45 }
 0x3c3   :  { %v1588_v37 = vadd.f32 %v1587_v53, %v1556_v29 }
 0x3c5   :  { %vm1602_vm7 = vcmp.ge.f32.partialorder %v1588_v37, 0.0  ;;  %v1607_v41 = vmul.f32 0.01, %v1588_v37 }
 0x3c7   :  { %v1612_v43 = vsel %vm1602_vm7, %v1588_v37, %v1607_v41  ;;  %v1590_v25 = vpop.f32.mrf.mxu2  ;;  %v1671_v37 = vpop.f32.mrf.mxu3 }
 0x3c8   :  { %v1674_v26 = vadd.f32 %v1660_v32, %v1612_v43  ;;  %v1558_v44 = vpop.f32.mrf.mxu1  ;;  %v1532_v2 = vpop.f32.mrf.mxu0  ;;  %v1672_v41 = vadd.f32 %v2551_v31, %v1671_v37  ;;  %v1800_v31 = vld [vmem:[%s2591_s18] ss:$0 sm:$0xff] }
 0x3c9   :  { %v1559_v49 = vadd.f32 %v1558_v44, %v1527_v42  ;;  %v1533_v51 = vadd.f32 %v2545_v16, %v1532_v2 }
 0x3ca   :  { %v1679_v17 = vmul.f32 %v2395_v39, %v1674_v26 }
 0x3cb   :  { %v1591_v18 = vadd.f32 %v1590_v25, %v1559_v49 }
 0x3cc   :  { %1684 = vst [vmem:[#allocation3 + $0x8] sm:$0xff] %v1679_v17 }
 0x3cd   :  { %vm1603_vm8 = vcmp.ge.f32.partialorder %v1591_v18, 0.0  ;;  %v1608_v56 = vmul.f32 0.01, %v1591_v18 }
 0x3cf   :  { %v1613_v59 = vsel %vm1603_vm8, %v1591_v18, %v1608_v56  ;;  %v1593_v60 = vpop.f32.mrf.mxu2 }
 0x3d0   :  { %v1675_v61 = vadd.f32 %v1663_v46, %v1613_v59  ;;  %v1561_v39 = vpop.f32.mrf.mxu1  ;;  %v1535_v34 = vpop.f32.mrf.mxu0 }
 0x3d1   :  { %v1562_v30 = vadd.f32 %v1561_v39, %v1530_v36  ;;  %v1536_v20 = vadd.f32 %v2545_v16, %v1535_v34 }
 0x3d2   :  { %v1680_v63 = vmul.f32 %v2405_v10, %v1675_v61  ;;  %v1709_v10 = vld [vmem:[#allocation19] sm:$0xff] }
 0x3d3   :  { %v1594_v4 = vadd.f32 %v1593_v60, %v1562_v30  ;;  %1744 = vmatpush.msrb.mxu0 %v1709_v10 }
 0x3d4   :  { %1685 = vst [vmem:[#allocation3 + $0x10] sm:$0xff] %v1680_v63  ;;  %v1691_v54 = vmax.f32 %v1679_v17, %v1680_v63 }
 0x3d5   :  { %vm1604_vm9 = vcmp.ge.f32.partialorder %v1594_v4, 0.0  ;;  %v1609_v6 = vmul.f32 0.01, %v1594_v4 }
 0x3d6   :  { %v1692_v40 = vrot.slane %v1691_v54, 4 }
 0x3d7   :  { %v1614_v1 = vsel %vm1604_vm9, %v1594_v4, %v1609_v6  ;;  %v1596_v9 = vpop.f32.mrf.mxu2 }
 0x3d8   :  { %v1676_v50 = vadd.f32 %v1666_v24, %v1614_v1  ;;  %v1564_v8 = vpop.f32.mrf.mxu1  ;;  %v1693_v42 = vmax.f32 %v1691_v54, %v1692_v40 }
 0x3d9   :  { %v1565_v12 = vadd.f32 %v1564_v8, %v1533_v51 }
 0x3da   :  { %v1681_v14 = vmul.f32 %v2422_v35, %v1676_v50  ;;  %v1694_v43 = vrot.slane %v1693_v42, 2 }
 0x3db   :  { %v1597_v15 = vadd.f32 %v1596_v9, %v1565_v12 }
 0x3dc   :  { %1686 = vst [vmem:[#allocation3 + $0x18] sm:$0xff] %v1681_v14  ;;  %v1695_v45 = vmax.f32 %v1693_v42, %v1694_v43 }
 0x3dd   :  { %vm1605_vm10 = vcmp.ge.f32.partialorder %v1597_v15, 0.0  ;;  %v1610_v0 = vmul.f32 0.01, %v1597_v15 }
 0x3de   :  { %v1696_v47 = vrot.slane %v1695_v45, 1 }
 0x3df   :  { %v1615_v22 = vsel %vm1605_vm10, %v1597_v15, %v1610_v0  ;;  %v1599_v33 = vpop.f32.mrf.mxu2 }
 0x3e0   :  { %v1677_v53 = vadd.f32 %v1669_v19, %v1615_v22  ;;  %v1567_v7 = vpop.f32.mrf.mxu1  ;;  %v1697_v21 = vmax.f32 %v1695_v45, %v1696_v47 }
 0x3e1   :  { %v1568_v28 = vadd.f32 %v1567_v7, %v1536_v20 }
 0x3e2   :  { %v1682_v29 = vmul.f32 %v2431_v13, %v1677_v53 }
 0x3e3   :  { %v1600_v35 = vadd.f32 %v1599_v33, %v1568_v28 }
 0x3e4   :  { %1687 = vst [vmem:[#allocation3 + $0x20] sm:$0xff] %v1682_v29 }
 0x3e5   :  { %vm1606_vm11 = vcmp.ge.f32.partialorder %v1600_v35, 0.0  ;;  %v1611_v23 = vmul.f32 0.01, %v1600_v35 }
 0x3e7   :  { %v1616_v32 = vsel %vm1606_vm11, %v1600_v35, %v1611_v23 }
 0x3e8   :  { %v1678_v48 = vadd.f32 %v1672_v41, %v1616_v32 }
 0x3ea   :  { %v1683_v16 = vmul.f32 %v2438_v27, %v1678_v48 }
 0x3ec   :  { %1688 = vst [vmem:[#allocation3 + $0x28] sm:$0xff] %v1683_v16  ;;  %v1700_v25 = vmax.f32 %v1682_v29, %v1683_v16 }
 0x3ee   :  { %v1701_v26 = vrot.slane %v1700_v25, 4 }
 0x3f0   :  { %v1702_v13 = vmax.f32 %v1700_v25, %v1701_v26 }
 0x3f2   :  { %v1703_v44 = vrot.slane %v1702_v13, 2 }
 0x3f4   :  { %v1704_v49 = vmax.f32 %v1702_v13, %v1703_v44 }
 0x3f6   :  { %v1705_v17 = vrot.slane %v1704_v49, 1 }
 0x3f8   :  { %v1706_v18 = vmax.f32 %v1704_v49, %v1705_v17 }
 0x3fa   :  { %v1708_v52 = vsel %vm1707_vm12, %v1697_v21, %v1706_v18 }
 0x3fb   :  { %1745 = vmatmul.f32.vlgmr.msrb.gmra.mxu0 %v1708_v52 }
 0x478   :  { %v1746_v27 = vpop.f32.mrf.mxu0 }
 0x479   :  { %v1747_v55 = vadd.f32 %v1800_v31, %v1746_v27 }
 0x47b   :  { %1749 = vst [vmem:[#allocation21] sm:$0x3] %v1747_v55 }
 0x47c   :  { %1760 = dma.vmem_to_hbm [thread:$0]  %s1756_s27, 32, %s1758_s29, [#allocation6]  }
 0x47d   :  { %2079 = dma.done.wait [#allocation6], 32  }
 0x47e   :  { %2080 = vsyncadd [#allocation6], 4294967264 }
 0x47f   :  { %1765 = vsyncpa [#allocation5], 1 }
 0x480   :  { %1766 = vsyncpa [#allocation8], 1 }
 0x481   :  { %1767 = vsyncpa [#allocation11], 1 }
 0x482   :  { %1768 = vsyncpa [#allocation14], 1 }
 0x483   :  { %1769 = vsyncpa [#allocation17], 1 }
 0x484   :  { %1770 = vsyncpa [#allocation20], 1 }
 0x485   :  { %1771 = vsyncpa [#allocation6], 1 }

</bundles_post_ra>
